<compile_context>
chip_gen: v6e
topology: v6e:2x2x1
jax: 0.10.0
libtpu: 0.0.40
codegen_flags: <defaults>
</compile_context>

<pallas_src>
import functools

import jax
import jax.numpy as jnp
from jax.experimental import pallas as pl
from jax.experimental.pallas import tpu as pltpu


LANE = 128  # lane width: pad feature / embed dims up to this


def _round_up(x, m):
    return (x + m - 1) // m * m


def _gcn_packed_kernel(a_ref, h_ref, mask_ref, scale_ref,
                       w1_ref, b1_ref, w2_ref, b2_ref, out_ref,
                       *, aggregate_first):
    # One super-block (GB block-diagonally packed graphs) per grid step.
    a = a_ref[0]        # (N_SUPER, N_SUPER) bf16 : block-diag D^-1/2 (A+I) D^-1/2
    h = h_ref[0]        # (N_SUPER, F_pad)   bf16 : stacked node features
    mask = mask_ref[0]  # (GB, N_SUPER)      bf16 : exact 0/1 per-graph pool mask
    scale = scale_ref[0]  # (GB, 1)          f32  : exact per-graph 1/n (0 if slot empty)

    w1 = w1_ref[...]    # (F_pad, E_pad) bf16
    w2 = w2_ref[...]    # (E_pad, E_pad) bf16
    b1 = b1_ref[...]    # (1, E_pad)     f32
    b2 = b2_ref[...]    # (1, E_pad)     f32

    # ---- conv1: GraphConv(input_dim -> embed_dim), norm='both' ------------
    # Static matmul-order choice (same trick as DGL): aggregate first when the
    # input feature dim is <= the output dim.
    if aggregate_first:
        ah = jnp.dot(a, h, preferred_element_type=jnp.float32)           # (N, F)
        x = jnp.dot(ah.astype(jnp.bfloat16), w1,
                    preferred_element_type=jnp.float32)                   # (N, E)
    else:
        hw = jnp.dot(h, w1, preferred_element_type=jnp.float32)          # (N, E)
        x = jnp.dot(a, hw.astype(jnp.bfloat16),
                    preferred_element_type=jnp.float32)                   # (N, E)
    x = jnp.maximum(x + b1, 0.0)                                          # f32 bias + ReLU

    # ---- AvgPooling #1: bf16 mask matmul (single-pass MXU) + exact f32 scale
    x_b = x.astype(jnp.bfloat16)                                          # reused for conv2
    skip1 = jnp.dot(mask, x_b, preferred_element_type=jnp.float32) * scale  # (GB, E)

    # ---- conv2: GraphConv(embed_dim -> embed_dim) --------------------------
    xw = jnp.dot(x_b, w2, preferred_element_type=jnp.float32)             # (N, E)
    x2 = jnp.dot(a, xw.astype(jnp.bfloat16),
                 preferred_element_type=jnp.float32)
    x2 = jnp.maximum(x2 + b2, 0.0)

    # ---- AvgPooling #2; "pooled" == skip2 bit-for-bit, so fold it ----------
    skip2 = jnp.dot(mask, x2.astype(jnp.bfloat16),
                    preferred_element_type=jnp.float32) * scale           # (GB, E)

    out_ref[0] = skip1 + 2.0 * skip2                                       # (GB, E) one vreg


def gcn_forward_packed(a_b, h_b, mask_b, scale_b, w1, b1, w2, b2):
    """Batched, graph-packed GCN forward.

    a_b     : (B, N_SUPER, N_SUPER) bf16   block-diagonal normalized adjacencies
    h_b     : (B, N_SUPER, F_pad)   bf16   stacked, zero-padded node features
    mask_b  : (B, GB, N_SUPER)      bf16   exact 0/1 per-graph pooling masks
    scale_b : (B, GB, 1)            f32    per-graph 1/n (0 for empty slots)
    w1,b1,w2,b2 : un-padded f32 parameters (F_in,E), (1,E), (E,E), (1,E)
    returns : (B*GB, E) f32 (one row per graph slot, in packing order)
    """
    b_count, n_super, _ = a_b.shape
    f_pad = h_b.shape[2]
    gb = mask_b.shape[1]
    f_in, e = w1.shape
    e_pad = _round_up(e, LANE)

    # Zero-pad parameters to lane-dense shapes; MXU operands in bf16.
    w1_p = jnp.zeros((f_pad, e_pad), jnp.float32).at[:f_in, :e].set(w1).astype(jnp.bfloat16)
    w2_p = jnp.zeros((e_pad, e_pad), jnp.float32).at[:e, :e].set(w2).astype(jnp.bfloat16)
    b1_p = jnp.zeros((1, e_pad), jnp.float32).at[:, :e].set(b1)
    b2_p = jnp.zeros((1, e_pad), jnp.float32).at[:, :e].set(b2)

    kernel = functools.partial(_gcn_packed_kernel, aggregate_first=(f_in <= e))

    out = pl.pallas_call(
        kernel,
        out_shape=jax.ShapeDtypeStruct((b_count, gb, e_pad), jnp.float32),
        grid=(b_count,),
        in_specs=[
            pl.BlockSpec((1, n_super, n_super), lambda b: (b, 0, 0)),  # A (block-diag)
            pl.BlockSpec((1, n_super, f_pad), lambda b: (b, 0, 0)),    # H
            pl.BlockSpec((1, gb, n_super), lambda b: (b, 0, 0)),       # pool mask
            pl.BlockSpec((1, gb, 1), lambda b: (b, 0, 0)),             # pool scale
            pl.BlockSpec((f_pad, e_pad), lambda b: (0, 0)),            # W1 (graph-invariant)
            pl.BlockSpec((1, e_pad), lambda b: (0, 0)),                # b1
            pl.BlockSpec((e_pad, e_pad), lambda b: (0, 0)),            # W2
            pl.BlockSpec((1, e_pad), lambda b: (0, 0)),                # b2
        ],
        out_specs=pl.BlockSpec((1, gb, e_pad), lambda b: (b, 0, 0)),
        compiler_params=pltpu.CompilerParams(
            dimension_semantics=("parallel",),       # >=2 super-blocks -> megacore on v7x
            vmem_limit_bytes=32 * 1024 * 1024,       # explicit; plenty for 256-row blocks
        ),
    )(a_b, h_b, mask_b, scale_b, w1_p, b1_p, w2_p, b2_p)

    return out.reshape(b_count * gb, e_pad)[:, :e]


def pack_graphs(a_hats, feats, slot, graphs_per_block, f_pad):
    """Pack graphs block-diagonally into super-blocks of slot*graphs_per_block rows."""
    g = len(a_hats)
    n_super = slot * graphs_per_block
    n_blocks = _round_up(g, graphs_per_block) // graphs_per_block
    a_list, h_list, m_list, s_list = [], [], [], []
    for b in range(n_blocks):
        a_sb = jnp.zeros((n_super, n_super), jnp.float32)
        h_sb = jnp.zeros((n_super, f_pad), jnp.float32)
        m_sb = jnp.zeros((graphs_per_block, n_super), jnp.float32)
        s_sb = jnp.zeros((graphs_per_block, 1), jnp.float32)
        for slot_idx in range(graphs_per_block):
            gi = b * graphs_per_block + slot_idx
            if gi >= g:
                break
            n = a_hats[gi].shape[0]
            assert n <= slot, "graph larger than packing slot"
            off = slot_idx * slot
            a_sb = a_sb.at[off:off + n, off:off + n].set(a_hats[gi])
            h_sb = h_sb.at[off:off + n, :feats[gi].shape[1]].set(feats[gi])
            m_sb = m_sb.at[slot_idx, off:off + n].set(1.0)
            s_sb = s_sb.at[slot_idx, 0].set(1.0 / n)
        a_list.append(a_sb)
        h_list.append(h_sb)
        m_list.append(m_sb)
        s_list.append(s_sb)
    a_b = jnp.stack(a_list).astype(jnp.bfloat16)      # (B, N_SUPER, N_SUPER)
    h_b = jnp.stack(h_list).astype(jnp.bfloat16)      # (B, N_SUPER, F_pad)
    mask_b = jnp.stack(m_list).astype(jnp.bfloat16)   # (B, GB, N_SUPER) exact 0/1
    scale_b = jnp.stack(s_list)                       # (B, GB, 1) f32
    return a_b, h_b, mask_b, scale_b


def normalize_adjacency(adj):
    """Symmetric normalization with self-loops: D^{-1/2} (A + I) D^{-1/2}."""
    n = adj.shape[0]
    a = adj + jnp.eye(n, dtype=adj.dtype)
    deg = jnp.sum(a, axis=1)
    d_inv_sqrt = jnp.where(deg > 0, 1.0 / jnp.sqrt(deg), 0.0)
    return a * d_inv_sqrt[:, None] * d_inv_sqrt[None, :]


def reference_forward(a_hat, h, w1, b1, w2, b2):
    """Pure f32 reference of the original module's forward for one graph."""
    x = jnp.maximum(a_hat @ (h @ w1) + b1, 0.0)
    skip1 = jnp.mean(x, axis=0, keepdims=True)
    x = jnp.maximum(a_hat @ (x @ w2) + b2, 0.0)
    skip2 = jnp.mean(x, axis=0, keepdims=True)
    pooled = jnp.mean(x, axis=0, keepdims=True)
    return skip1 + skip2 + pooled


if __name__ == "__main__":
    INPUT_DIM = 16
    EMBED_DIM = 32
    SLOT = 32               # max nodes per packed graph slot
    GRAPHS_PER_BLOCK = 8    # 8 * 32 = 256-row super-blocks (fills v6e/v7x MXU)
    NODE_COUNTS = [32, 27, 20, 32, 18, 25, 31, 24,
                   29, 22, 32, 16, 30, 21, 28, 19]   # G=16 -> 2 super-blocks
    G = len(NODE_COUNTS)

    key = jax.random.PRNGKey(0)
    key, k_w1, k_w2 = jax.random.split(key, 3)

    # Deterministic parameter init (Glorot-style scaling, GraphConv shapes).
    w1 = jax.random.normal(k_w1, (INPUT_DIM, EMBED_DIM), jnp.float32) * (
        1.0 / jnp.sqrt(INPUT_DIM))
    b1 = jnp.zeros((1, EMBED_DIM), jnp.float32)
    w2 = jax.random.normal(k_w2, (EMBED_DIM, EMBED_DIM), jnp.float32) * (
        1.0 / jnp.sqrt(EMBED_DIM))
    b2 = jnp.zeros((1, EMBED_DIM), jnp.float32)

    f_pad = _round_up(INPUT_DIM, LANE)

    # Deterministic synthetic undirected graphs (no pre-existing self loops).
    a_hats, feats = [], []
    for n in NODE_COUNTS:
        key, k_adj, k_h = jax.random.split(key, 3)
        raw = jax.random.uniform(k_adj, (n, n))
        adj = (raw + raw.T > 1.2).astype(jnp.float32)
        adj = adj * (1.0 - jnp.eye(n, dtype=jnp.float32))
        a_hats.append(normalize_adjacency(adj))                 # (n, n) f32
        feats.append(jax.random.normal(k_h, (n, INPUT_DIM), jnp.float32))

    a_b, h_b, mask_b, scale_b = pack_graphs(a_hats, feats, SLOT, GRAPHS_PER_BLOCK, f_pad)

    out = gcn_forward_packed(a_b, h_b, mask_b, scale_b, w1, b1, w2, b2)
    out = jax.block_until_ready(out)[:G]
    assert out.shape == (G, EMBED_DIM)

    # Matched-precision reference: f32 math mirroring the kernel's matmul order
    # and bf16 rounding of every MXU operand (tight tolerance — checks the
    # kernel math itself).
    def _bf(x):
        return x.astype(jnp.bfloat16).astype(jnp.float32)

    w1_r = _bf(w1)
    w2_r = _bf(w2)
    matched, refs = [], []
    for g in range(G):
        a_r = _bf(a_hats[g])
        h_r = _bf(feats[g])
        ah = a_r @ h_r
        x = jnp.maximum(_bf(ah) @ w1_r + b1, 0.0)
        xb = _bf(x)
        skip1 = jnp.mean(xb, axis=0, keepdims=True)
        xw = xb @ w2_r
        x2 = jnp.maximum(a_r @ _bf(xw) + b2, 0.0)
        skip2 = jnp.mean(_bf(x2), axis=0, keepdims=True)
        matched.append(skip1 + 2.0 * skip2)
        refs.append(reference_forward(a_hats[g], feats[g], w1, b1, w2, b2))
    matched = jnp.concatenate(matched, axis=0)        # (G, E)
    ref = jnp.concatenate(refs, axis=0)               # (G, E)

    assert jnp.allclose(out, matched, atol=2e-2, rtol=2e-2), \
        "mismatch vs matched-precision JAX reference"
    # Full-f32 reference sanity check (looser: bf16 MXU operands round at ~1e-2).
    assert jnp.allclose(out, ref, atol=1e-1, rtol=1e-1), \
        "mismatch vs f32 JAX reference"

    print("KERNEL_OK")
</pallas_src>

<mosaic_0001>
module attributes {stable_mosaic.version = 11 : i64} {
  func.func @_gcn_packed_kernel(%arg0: i32, %arg1: memref<1x256x256xbf16, #tpu.memory_space<vmem>>, %arg2: memref<1x256x128xbf16, #tpu.memory_space<vmem>>, %arg3: memref<1x8x256xbf16, #tpu.memory_space<vmem>>, %arg4: memref<1x8x1xf32, #tpu.memory_space<vmem>>, %arg5: memref<128x128xbf16, #tpu.memory_space<vmem>>, %arg6: memref<1x128xf32, #tpu.memory_space<vmem>>, %arg7: memref<128x128xbf16, #tpu.memory_space<vmem>>, %arg8: memref<1x128xf32, #tpu.memory_space<vmem>>, %arg9: memref<1x8x128xf32, #tpu.memory_space<vmem>>) attributes {dimension_semantics = [#tpu.dimension_semantics<parallel>], iteration_bounds = array<i64: 2>, scalar_prefetch = 0 : i64, scratch_operands = 0 : i64, tpu.core_type = #tpu.core_type<tc>, window_params = [{transform_indices = @transform_0, window_bounds = array<i64: 1, 256, 256>}, {transform_indices = @transform_1, window_bounds = array<i64: 1, 256, 128>}, {transform_indices = @transform_2, window_bounds = array<i64: 1, 8, 256>}, {transform_indices = @transform_3, window_bounds = array<i64: 1, 8, 1>}, {pipeline_mode = #tpu.pipeline_mode<synchronous>, transform_indices = @transform_4, window_bounds = array<i64: 128, 128>}, {pipeline_mode = #tpu.pipeline_mode<synchronous>, transform_indices = @transform_5, window_bounds = array<i64: 1, 128>}, {pipeline_mode = #tpu.pipeline_mode<synchronous>, transform_indices = @transform_6, window_bounds = array<i64: 128, 128>}, {pipeline_mode = #tpu.pipeline_mode<synchronous>, transform_indices = @transform_7, window_bounds = array<i64: 1, 128>}, {transform_indices = @transform_8, window_bounds = array<i64: 1, 8, 128>}]} {
    %c0 = arith.constant 0 : index
    %c0_0 = arith.constant 0 : index
    %c0_1 = arith.constant 0 : index
    %0 = vector.load %arg1[%c0, %c0_0, %c0_1] : memref<1x256x256xbf16, #tpu.memory_space<vmem>>, vector<1x256x256xbf16>
    %1 = vector.shape_cast %0 : vector<1x256x256xbf16> to vector<256x256xbf16>
    %c0_2 = arith.constant 0 : index
    %c0_3 = arith.constant 0 : index
    %c0_4 = arith.constant 0 : index
    %2 = vector.load %arg2[%c0_2, %c0_3, %c0_4] : memref<1x256x128xbf16, #tpu.memory_space<vmem>>, vector<1x256x128xbf16>
    %3 = vector.shape_cast %2 : vector<1x256x128xbf16> to vector<256x128xbf16>
    %c0_5 = arith.constant 0 : index
    %c0_6 = arith.constant 0 : index
    %c0_7 = arith.constant 0 : index
    %4 = vector.load %arg3[%c0_5, %c0_6, %c0_7] : memref<1x8x256xbf16, #tpu.memory_space<vmem>>, vector<1x8x256xbf16>
    %5 = vector.shape_cast %4 : vector<1x8x256xbf16> to vector<8x256xbf16>
    %c0_8 = arith.constant 0 : index
    %c0_9 = arith.constant 0 : index
    %c0_10 = arith.constant 0 : index
    %6 = vector.load %arg4[%c0_8, %c0_9, %c0_10] : memref<1x8x1xf32, #tpu.memory_space<vmem>>, vector<1x8x1xf32>
    %7 = vector.shape_cast %6 : vector<1x8x1xf32> to vector<8x1xf32>
    %c0_11 = arith.constant 0 : index
    %c0_12 = arith.constant 0 : index
    %8 = vector.load %arg5[%c0_11, %c0_12] : memref<128x128xbf16, #tpu.memory_space<vmem>>, vector<128x128xbf16>
    %c0_13 = arith.constant 0 : index
    %c0_14 = arith.constant 0 : index
    %9 = vector.load %arg7[%c0_13, %c0_14] : memref<128x128xbf16, #tpu.memory_space<vmem>>, vector<128x128xbf16>
    %c0_15 = arith.constant 0 : index
    %c0_16 = arith.constant 0 : index
    %10 = vector.load %arg6[%c0_15, %c0_16] : memref<1x128xf32, #tpu.memory_space<vmem>>, vector<1x128xf32>
    %c0_17 = arith.constant 0 : index
    %c0_18 = arith.constant 0 : index
    %11 = vector.load %arg8[%c0_17, %c0_18] : memref<1x128xf32, #tpu.memory_space<vmem>>, vector<1x128xf32>
    %cst = arith.constant dense<0.000000e+00> : vector<256x128xf32>
    %12 = tpu.matmul %1, %3, %cst {dimension_numbers = #tpu.dot_dimension_numbers<[1], [0], [0], [1], [0, 0, 1, 1], [], []>} : vector<256x256xbf16>, vector<256x128xbf16>, vector<256x128xf32> -> vector<256x128xf32>
    %13 = arith.truncf %12 : vector<256x128xf32> to vector<256x128xbf16>
    %cst_19 = arith.constant dense<0.000000e+00> : vector<256x128xf32>
    %14 = tpu.matmul %13, %8, %cst_19 {dimension_numbers = #tpu.dot_dimension_numbers<[1], [0], [0], [1], [0, 0, 1, 1], [], []>} : vector<256x128xbf16>, vector<128x128xbf16>, vector<256x128xf32> -> vector<256x128xf32>
    %15 = vector.broadcast %10 : vector<1x128xf32> to vector<256x128xf32>
    %16 = arith.addf %14, %15 : vector<256x128xf32>
    %cst_20 = arith.constant 0.000000e+00 : f32
    %17 = vector.broadcast %cst_20 : f32 to vector<256x128xf32>
    %18 = arith.maximumf %16, %17 : vector<256x128xf32>
    %19 = arith.truncf %18 : vector<256x128xf32> to vector<256x128xbf16>
    %cst_21 = arith.constant dense<0.000000e+00> : vector<8x128xf32>
    %20 = tpu.matmul %5, %19, %cst_21 {dimension_numbers = #tpu.dot_dimension_numbers<[1], [0], [0], [1], [0, 0, 1, 1], [], []>} : vector<8x256xbf16>, vector<256x128xbf16>, vector<8x128xf32> -> vector<8x128xf32>
    %21 = vector.broadcast %7 : vector<8x1xf32> to vector<8x128xf32>
    %22 = arith.mulf %20, %21 : vector<8x128xf32>
    %cst_22 = arith.constant dense<0.000000e+00> : vector<256x128xf32>
    %23 = tpu.matmul %19, %9, %cst_22 {dimension_numbers = #tpu.dot_dimension_numbers<[1], [0], [0], [1], [0, 0, 1, 1], [], []>} : vector<256x128xbf16>, vector<128x128xbf16>, vector<256x128xf32> -> vector<256x128xf32>
    %24 = arith.truncf %23 : vector<256x128xf32> to vector<256x128xbf16>
    %cst_23 = arith.constant dense<0.000000e+00> : vector<256x128xf32>
    %25 = tpu.matmul %1, %24, %cst_23 {dimension_numbers = #tpu.dot_dimension_numbers<[1], [0], [0], [1], [0, 0, 1, 1], [], []>} : vector<256x256xbf16>, vector<256x128xbf16>, vector<256x128xf32> -> vector<256x128xf32>
    %26 = vector.broadcast %11 : vector<1x128xf32> to vector<256x128xf32>
    %27 = arith.addf %25, %26 : vector<256x128xf32>
    %cst_24 = arith.constant 0.000000e+00 : f32
    %28 = vector.broadcast %cst_24 : f32 to vector<256x128xf32>
    %29 = arith.maximumf %27, %28 : vector<256x128xf32>
    %30 = arith.truncf %29 : vector<256x128xf32> to vector<256x128xbf16>
    %cst_25 = arith.constant dense<0.000000e+00> : vector<8x128xf32>
    %31 = tpu.matmul %5, %30, %cst_25 {dimension_numbers = #tpu.dot_dimension_numbers<[1], [0], [0], [1], [0, 0, 1, 1], [], []>} : vector<8x256xbf16>, vector<256x128xbf16>, vector<8x128xf32> -> vector<8x128xf32>
    %32 = vector.broadcast %7 : vector<8x1xf32> to vector<8x128xf32>
    %33 = arith.mulf %31, %32 : vector<8x128xf32>
    %cst_26 = arith.constant 2.000000e+00 : f32
    %34 = vector.broadcast %cst_26 : f32 to vector<8x128xf32>
    %35 = arith.mulf %34, %33 : vector<8x128xf32>
    %36 = arith.addf %22, %35 : vector<8x128xf32>
    %c0_27 = arith.constant 0 : index
    %c0_28 = arith.constant 0 : index
    %c0_29 = arith.constant 0 : index
    %37 = vector.load %arg9[%c0_27, %c0_28, %c0_29] : memref<1x8x128xf32, #tpu.memory_space<vmem>>, vector<1x8x128xf32>
    %38 = vector.shape_cast %37 : vector<1x8x128xf32> to vector<8x128xf32>
    %39 = vector.shape_cast %36 : vector<8x128xf32> to vector<1x8x128xf32>
    tpu.vector_store %arg9[%c0_27, %c0_28, %c0_29], %39 {strides = array<i32>} : memref<1x8x128xf32, #tpu.memory_space<vmem>>, vector<1x8x128xf32>,
    return
  }
  func.func @transform_0(%arg0: i32) -> (i32, i32, i32) {
    %c0_i32 = arith.constant 0 : i32
    %c0_i32_0 = arith.constant 0 : i32
    %c0_i32_1 = arith.constant 0 : i32
    return %arg0, %c0_i32, %c0_i32_0 : i32, i32, i32
  }
  func.func @transform_1(%arg0: i32) -> (i32, i32, i32) {
    %c0_i32 = arith.constant 0 : i32
    %c0_i32_0 = arith.constant 0 : i32
    %c0_i32_1 = arith.constant 0 : i32
    return %arg0, %c0_i32, %c0_i32_0 : i32, i32, i32
  }
  func.func @transform_2(%arg0: i32) -> (i32, i32, i32) {
    %c0_i32 = arith.constant 0 : i32
    %c0_i32_0 = arith.constant 0 : i32
    %c0_i32_1 = arith.constant 0 : i32
    return %arg0, %c0_i32, %c0_i32_0 : i32, i32, i32
  }
  func.func @transform_3(%arg0: i32) -> (i32, i32, i32) {
    %c0_i32 = arith.constant 0 : i32
    %c0_i32_0 = arith.constant 0 : i32
    %c0_i32_1 = arith.constant 0 : i32
    return %arg0, %c0_i32, %c0_i32_0 : i32, i32, i32
  }
  func.func @transform_4(%arg0: i32) -> (i32, i32) {
    %c0_i32 = arith.constant 0 : i32
    %c0_i32_0 = arith.constant 0 : i32
    %c0_i32_1 = arith.constant 0 : i32
    return %c0_i32, %c0_i32_0 : i32, i32
  }
  func.func @transform_5(%arg0: i32) -> (i32, i32) {
    %c0_i32 = arith.constant 0 : i32
    %c0_i32_0 = arith.constant 0 : i32
    %c0_i32_1 = arith.constant 0 : i32
    return %c0_i32, %c0_i32_0 : i32, i32
  }
  func.func @transform_6(%arg0: i32) -> (i32, i32) {
    %c0_i32 = arith.constant 0 : i32
    %c0_i32_0 = arith.constant 0 : i32
    %c0_i32_1 = arith.constant 0 : i32
    return %c0_i32, %c0_i32_0 : i32, i32
  }
  func.func @transform_7(%arg0: i32) -> (i32, i32) {
    %c0_i32 = arith.constant 0 : i32
    %c0_i32_0 = arith.constant 0 : i32
    %c0_i32_1 = arith.constant 0 : i32
    return %c0_i32, %c0_i32_0 : i32, i32
  }
  func.func @transform_8(%arg0: i32) -> (i32, i32, i32) {
    %c0_i32 = arith.constant 0 : i32
    %c0_i32_0 = arith.constant 0 : i32
    %c0_i32_1 = arith.constant 0 : i32
    return %arg0, %c0_i32, %c0_i32_0 : i32, i32, i32
  }
}

</mosaic_0001>

<bundles_post_ra>
// kernel: tpu_custom_call.1
= control target key start
LH: loop header
LB: loop body
LE: loop exit
PB: predicated region body
PF: predicated region fallthrough
CT: control target
= control target key end

     0   :  { %s3457_s0 = inlined_call_operand.hbm [shape: bf16[2,256,256], index: 0, kind: input, shape index: {}]   ;;  %s3458_s1 = inlined_call_operand.hbm [shape: bf16[2,256,128], index: 1, kind: input, shape index: {}]   ;;  %s3459_s2 = inlined_call_operand.vmem [shape: bf16[2,8,256], index: 2, kind: input, shape index: {}]   ;;  %s3460_s3 = inlined_call_operand.vmem [shape: f32[2,8,1], index: 3, kind: input, shape index: {}]   ;;  %s3461_s4 = inlined_call_operand.hbm [shape: bf16[128,128], index: 4, kind: input, shape index: {}]   ;;  %s3462_s5 = inlined_call_operand.vmem [shape: f32[1,128], index: 5, kind: input, shape index: {}]   ;;  %s3463_s6 = inlined_call_operand.hbm [shape: bf16[128,128], index: 6, kind: input, shape index: {}]   ;;  %s3464_s7 = inlined_call_operand.vmem [shape: f32[1,128], index: 7, kind: input, shape index: {}]   ;;  %s3465_s8 = inlined_call_operand.hbm [shape: f32[2,8,128], index: 8, kind: output, shape index: {}]  }
   0x1   :  { %3482 = sst [smem:[#allocation27_spill]] %s3457_s0 }
   0x2   :  { %3483 = sst [smem:[#allocation28_spill]] %s3461_s4 }
   0x3   :  { %3484 = sst [smem:[#allocation29_spill]] %s3463_s6 }
   0x4   :  { %13 = vsyncpa [#allocation3], 0 }
   0x5   :  { %15 = vsyncpa [#allocation3 + $0x1], 0 }
   0x6   :  { %16 = vsyncpa [#allocation6], 0 }
   0x7   :  { %18 = vsyncpa [#allocation6 + $0x1], 0 }
   0x8   :  { %19 = vsyncpa [#allocation9], 0 }
   0x9   :  { %20 = vsyncpa [#allocation4], 0 }
   0xa   :  { %22 = vsyncpa [#allocation4 + $0x1], 0  ;;  %s2842_s27 = smov 0   ;;  %s2844_s28 = smov 0  }
   0xb   :  { %s2846_s29 = smov 0   ;;  %s2848_s30 = smov 0  }
   0xc LB: > { %3485 = sst [smem:[#allocation16_spill]] %s2781_s29  ;;  %s2863_s9 = sadd.s32 4294967295, %s2785_s30   ;;  %s2785_s30 = sphi %s2848_s30, %s3525_s30   ;;  %s2781_s29 = sphi %s2846_s29, %s3527_s29   ;;  %s2777_s28 = sphi %s2844_s28, %s3529_s28   ;;  %s2773_s27 = sphi %s2842_s27, %s3528_s27  }
   0xd   : > { %s1914_s10 = sadd.s32 4294967294, %s2785_s30   ;;  %p48_p0 = scmp.ne.s32.totalorder %s2777_s28, %s2773_s27 }
   0xe   : > { %p3468_p1 = scmp.eq.s32.totalorder %s2863_s9, 0  ;;  %p234_p2 = scmp.eq.s32.totalorder %s2863_s9, 1 }
   0xf   : > { %p240_p3 = scmp.eq.s32.totalorder %s1914_s10, 1  ;;  %p1915_p5 = scmp.ge.s32.totalorder %s2785_s30, 1 }
  0x10   : > { %p2872_p4 = por %p3468_p1, %p48_p0  ;;  %p247_p7 = scmp.lt.s32.totalorder %s2785_s30, 3 }
  0x11   : > { %p2877_p6 = por %p240_p3, %p48_p0  ;;  %s2787_s14 = smov [#allocation7]  }
  0x12   : > { %s3486_s11 = scalar_select %p2872_p4, 1, 0 }
  0x13   : > { %s3487_s12 = scalar_select %p2877_p6, 1, 0 }
  0x14   : > { %p2882_p8 = pnand %p1915_p5, %p247_p7  ;;  %s259_s15 = sshll.u32 %s2787_s14, 4  ;;  %s260_s15 = int_to_ptr.vmem [resolvable:$true] %s259_s15 }
  0x15   : > { %s2788_s17 = smov [#allocation8]   ;;  %s2612_s19 = scalar_lea.vmem %s260_s15, 1024 }
  0x16   : > { %p2451_p9 = pneg %p2882_p8  ;;  %s275_s18 = sshll.u32 %s2788_s17, 4  ;;  %s276_s18 = int_to_ptr.vmem [resolvable:$true] %s275_s18 }
  0x17   : > { %p2613_p13 = scmp.ne.s32.totalorder %s260_s15, %s2612_s19  ;;  %p2620_p5 = scmp.lt.s32.totalorder %s260_s15, %s260_s15 }
  0x18   : > { %p2891_p11 = pnand %p2451_p9, %p3468_p1  ;;  %p2621_p7 = scmp.lt.s32.totalorder %s2612_s19, %s2612_s19 }
  0x1a   : > { %p2603_p12 = pneg %p2891_p11  ;;  %p2622_p10 = por %p2621_p7, %p2620_p5 }
  0x1c   : > { %p2615_p0 = pnand %p2613_p13, %p2603_p12 }
  0x1e   : > { %p2616_p3 = pneg %p2615_p0 }
  0x20   : > { %p2623_p9 = pnand %p2622_p10, %p2616_p3 }
  0x22   : > { %2626 = shalt.err (!%p2623_p9)
}
  0x23   : > { %s3466_s20 = smov 64   ;;  %s3467_s21 = smov 4  }
  0x24   : > { %s3490_s4 = sld [smem:[#allocation28_spill]]  ;;  %s2638_s24 = scalar_lea.vmem %s276_s18, 1024 }
  0x25   : > { %p2639_p13 = scmp.ne.s32.totalorder %s276_s18, %s2638_s24  ;;  %p2646_p10 = scmp.lt.s32.totalorder %s276_s18, %s276_s18 }
  0x26   : > { %p2647_p3 = scmp.lt.s32.totalorder %s2638_s24, %s2638_s24 }
  0x27   : > { %p2641_p0 = pnand %p2639_p13, %p2603_p12 }
  0x28   : > { %p2648_p7 = por %p2647_p3, %p2646_p10 }
  0x29   : > { %p2642_p5 = pneg %p2641_p0 }
  0x2a   : > { %2454 = dma.hbm_to_vmem [thread:$0]  (!%p2891_p11), %s3490_s4, 1024, %s260_s15, [#allocation6], %s3466_s20, %s3466_s20, %s3467_s21  }
  0x2b   : > { %p2649_p9 = pnand %p2648_p7, %p2642_p5 }
  0x2d   : > { %2652 = shalt.err (!%p2649_p9)
}
  0x2e   : > { %s3491_s6 = sld [smem:[#allocation29_spill]]  ;;  %s2920_s10 = sadd.s32 1, %s2785_s30  }
  0x2f   : > { %3492 = sst [smem:[#allocation17_spill]] %s2920_s10  ;;  %s35_s14 = sadd.s32 1, %s2781_s29 }
  0x30   : > { %s32_s15 = ssub.s32 %s2785_s30, %s2920_s10  ;;  %p42_p12 = scmp.ne.s32.totalorder %s2781_s29, %s2777_s28 }
  0x31   : > { %p33_p13 = scmp.eq.s32.totalorder %s32_s15, 0  ;;  %p43_p0 = scmp.eq.s32.totalorder %s2785_s30, 0 }
  0x32   : > { %p2930_p5 = por %p234_p2, %p42_p12  ;;  %p2471_p10 = scmp.lt.s32.totalorder %s2785_s30, 2 }
  0x33   : > { %s2936_s17 = scalar_select %p33_p13, %s2781_s29, %s35_s14  }
  0x34   : > { %2457 = dma.hbm_to_vmem [thread:$0]  (!%p2891_p11), %s3491_s6, 1024, %s276_s18, [#allocation9], %s3466_s20, %s3466_s20, %s3467_s21  }
  0x35   : > { %s3493_s16 = scalar_select %p2930_p5, 1, 0 }
  0x36   : > { %3494 = sst [smem:[#allocation18_spill]] %s2936_s17  ;;  %p44_p3 = por %p43_p0, %p42_p12 }
  0x37   : > { %s2939_s19 = sand.u32 1, %s2781_s29   ;;  %s2006_s22 = sshll.u32 %s2785_s30, 12 }
  0x38   : > { %s1919_s18 = sshll.u32 %s2939_s19, 8  ;;  %s3495_s0 = sld [smem:[#allocation27_spill]] }
  0x39   : > { %s296_s26 = scalar_lea.vmem [#allocation2], %s1919_s18  ;;  %p2950_p2 = pnand %p2471_p10, %p44_p3 }
  0x3a   : > { %s303_s15 = sshll.u32 %s296_s26, 4  ;;  %s2948_s15 = int_to_ptr.vmem [resolvable:$true] %s303_s15 }
  0x3b   : > { %p2655_p7 = pneg %p2950_p2 }
  0x3e   : > { %s2946_s25 = scalar_lea.hbm %s3495_s0, %s2006_s22  ;;  %s2658_s23 = scalar_lea.hbm %s3495_s0, 8192 }
  0x3f   : > { %s2653_s4 = scalar_lea.hbm %s2946_s25, 4096  ;;  %p2659_p13 = scmp.lt.s32.totalorder %s2946_s25, %s3495_s0 }
  0x40   : > { %p2654_p11 = scmp.ne.s32.totalorder %s2946_s25, %s2653_s4  ;;  %p2660_p0 = scmp.lt.s32.totalorder %s2658_s23, %s2653_s4 }
  0x42   : > { %p2656_p9 = pnand %p2655_p7, %p2654_p11  ;;  %p2661_p10 = por %p2660_p0, %p2659_p13 }
  0x44   : > { %p2657_p12 = pneg %p2656_p9 }
  0x46   : > { %p2662_p3 = pnand %p2661_p10, %p2657_p12 }
  0x48   : > { %2665 = shalt.err (!%p2662_p3)
}
  0x49   : > { %s2666_s20 = scalar_lea.vmem %s2948_s15, 4096  ;;  %s2791_s18 = smov [#allocation2]  }
  0x4a   : > { %p2667_p1 = scmp.ne.s32.totalorder %s2948_s15, %s2666_s20  ;;  %s2671_s22 = sshll.u32 %s2791_s18, 4  ;;  %s2672_s22 = int_to_ptr.vmem [resolvable:$false] %s2671_s22 }
  0x4b   : > { %s2673_s21 = scalar_lea.vmem %s2672_s22, 8192  ;;  %p2674_p6 = scmp.lt.s32.totalorder %s2948_s15, %s2672_s22 }
  0x4c   : > { %p2669_p11 = pnand %p2667_p1, %p2655_p7  ;;  %p2675_p5 = scmp.lt.s32.totalorder %s2673_s21, %s2666_s20 }
  0x4e   : > { %p2670_p9 = pneg %p2669_p11  ;;  %p2676_p4 = por %p2675_p5, %p2674_p6 }
  0x50   : > { %p2677_p13 = pnand %p2676_p4, %p2670_p9 }
  0x52   : > { %2680 = shalt.err (!%p2677_p13)
}
  0x53   : > { %s2792_s4 = smov 128   ;;  %s2793_s23 = smov 8  }
  0x54   : > { %s3497_s24 = scalar_lea.sflag [#allocation3], %s2939_s19  ;;  %s1922_s26 = sshll.u32 %s2939_s19, 7 }
  0x55   : > { %2461 = dma.hbm_to_vmem [thread:$0]  (!%p2950_p2), %s2946_s25, 4096, %s2948_s15, %s3497_s24, %s2792_s4, %s2792_s4, %s2793_s23  }
  0x56   : > { %s2007_s18 = sshll.u32 %s2785_s30, 11  ;;  %s317_s0 = scalar_lea.vmem [#allocation5], %s1922_s26 }
  0x57   : > { %s2987_s21 = scalar_lea.hbm %s3458_s1, %s2007_s18  ;;  %s324_s6 = sshll.u32 %s317_s0, 4  ;;  %s2989_s6 = int_to_ptr.vmem [resolvable:$true] %s324_s6 }
  0x58   : > { %s3498_s17 = sand.u32 1, %s2785_s30   ;;  %s2681_s10 = scalar_lea.hbm %s2987_s21, 2048 }
  0x59   : > { %s314_s29 = scalar_lea.sflag [#allocation6], %s3498_s17  ;;  %p2682_p1 = scmp.ne.s32.totalorder %s2987_s21, %s2681_s10 }
  0x5a   : > { %s2686_s15 = scalar_lea.hbm %s3458_s1, 4096  ;;  %p2687_p5 = scmp.lt.s32.totalorder %s2987_s21, %s3458_s1 }
  0x5b   : > { %p2684_p4 = pnand %p2682_p1, %p2655_p7  ;;  %p2688_p12 = scmp.lt.s32.totalorder %s2686_s15, %s2681_s10 }
  0x5d   : > { %p2685_p6 = pneg %p2684_p4  ;;  %p2689_p0 = por %p2688_p12, %p2687_p5 }
  0x5f   : > { %p2690_p10 = pnand %p2689_p0, %p2685_p6 }
  0x61   : > { %2693 = shalt.err (!%p2690_p10)
}
  0x62   : > { %s2694_s0 = scalar_lea.vmem %s2989_s6, 2048  ;;  %s2794_s17 = smov [#allocation5]  }
  0x63   : > { %p2695_p3 = scmp.ne.s32.totalorder %s2989_s6, %s2694_s0  ;;  %s2699_s24 = sshll.u32 %s2794_s17, 4  ;;  %s2700_s24 = int_to_ptr.vmem [resolvable:$false] %s2699_s24 }
  0x64   : > { %s2701_s26 = scalar_lea.vmem %s2700_s24, 4096  ;;  %p2702_p13 = scmp.lt.s32.totalorder %s2989_s6, %s2700_s24 }
  0x65   : > { %p2697_p11 = pnand %p2695_p3, %p2655_p7  ;;  %p2703_p1 = scmp.lt.s32.totalorder %s2701_s26, %s2694_s0 }
  0x67   : > { %p2698_p9 = pneg %p2697_p11  ;;  %p2704_p4 = por %p2703_p1, %p2702_p13 }
  0x69   : > { %p2705_p5 = pnand %p2704_p4, %p2698_p9 }
  0x6b   : > { %2708 = shalt.err (!%p2705_p5)
}
  0x6c   : > { %s3499_s10 = smov 4   ;;  %s3500_s18 = smov 64  }
  0x6d   : > { %2464 = dma.hbm_to_vmem [thread:$0]  (!%p2950_p2), %s2987_s21, 2048, %s2989_s6, %s314_s29, %s3500_s18, %s3500_s18, %s3499_s10  }
  0x6e   : > { %351 = sbr.rel (%p2882_p8) target bundleno = 1591 (0x637), region = 52 }
  0x73   : > { %s3021_s22 = sand.u32 1, %s2777_s28   ;;  %p3501_p7 = scmp.ne.s32.totalorder %s3486_s11, 0 }
  0x74   : > { %s1926_s20 = sshll.u32 %s3021_s22, 8  ;;  %s354_s19 = scalar_lea.sflag [#allocation3], %s3021_s22 }
  0x75   : > { %s3025_s25 = scalar_lea.vmem [#allocation2], %s1926_s20 }
  0x76   : > { %2752 = dma.done.wait (%p3501_p7), %s354_s19, 4096  }
  0x77   : > { %2754 = vsyncadd (%p3501_p7), %s354_s19, 4294963200  ;;  %s362_s6 = sand.u32 1, %s2863_s9   ;;  %s1927_s29 = sshll.u32 %s3021_s22, 7 }
  0x78   : > { %s363_s13 = scalar_lea.sflag [#allocation6], %s362_s6  ;;  %s3033_s14 = scalar_lea.vmem [#allocation5], %s1927_s29 }
  0x79   : > { %2756 = dma.done.wait (%p3501_p7), %s363_s13, 2048  }
  0x7a   : > { %2758 = vsyncadd (%p3501_p7), %s363_s13, 4294965248  ;;  %p3502_p8 = scmp.eq.s32.totalorder %s2863_s9, 0 }
  0x7c   : > { %2760 = dma.done.wait (%p3502_p8), [#allocation6], 1024   ;;  %p3503_p2 = pmov %p3502_p8 }
  0x7e   : > { %2762 = vsyncadd (%p3503_p2), [#allocation6], 4294966272  ;;  %p3504_p6 = pmov %p3503_p2 }
  0x7f   : > { %p3505_p12 = pmov %p3503_p2 }
  0x80   : > { %2764 = dma.done.wait (%p3504_p6), [#allocation9], 1024  }
  0x81   : > { %2766 = vsyncadd (%p3505_p12), [#allocation9], 4294966272  ;;  %v2515_v0 = vld [vmem:[%s3033_s14 + $0x78] sm:$0xff]   ;;  %v2517_v2 = vld [vmem:[%s3033_s14 + $0x70] sm:$0xff]   ;;  %p421_p0 = scmp.lt.s32.totalorder %s2863_s9, 1  ;;  %s1930_s19 = sshll.u32 %s3021_s22, 3 }
  0x82   : > { %v2516_v1 = vld [vmem:[%s3033_s14 + $0x38] sm:$0xff]   ;;  %2009 = vmatprep.subr.bf16.mxu0 %v2515_v0  ;;  %2421 = vmatprep.subr.bf16.mxu1 %v2515_v0  ;;  %v2518_v3 = vld [vmem:[%s3033_s14 + $0x30] sm:$0xff]   ;;  %v2519_v4 = vld [vmem:[%s3033_s14 + $0x68] sm:$0xff]   ;;  %s420_s6 = scalar_lea.vmem [#allocation10], %s1930_s19  ;;  %p3522_p3 = scmp.ne.s32.totalorder %s3493_s16, 0 }
  0x83   : > { %2010 = vmatpush3.bf16.msra.mxu0 %v2516_v1  ;;  %2429 = vmatpush3.bf16.msra.mxu1 %v2516_v1  ;;  %v2520_v5 = vld [vmem:[%s3033_s14 + $0x28] sm:$0xff]   ;;  %v2521_v6 = vld [vmem:[%s3033_s14 + $0x60] sm:$0xff]   ;;  %v2523_v8 = vld [vmem:[%s3033_s14 + $0x58] sm:$0xff]   ;;  %s3194_s11 = scalar_select %p421_p0, %s2863_s9, 1 }
  0x84   : > { %2011 = vmatprep.subr.bf16.mxu0 %v2517_v2  ;;  %2422 = vmatprep.subr.bf16.mxu1 %v2517_v2  ;;  %v2522_v7 = vld [vmem:[%s3033_s14 + $0x20] sm:$0xff]   ;;  %v2524_v9 = vld [vmem:[%s3033_s14 + $0x18] sm:$0xff]   ;;  %v2525_v10 = vld [vmem:[%s3033_s14 + $0x50] sm:$0xff]   ;;  %s1778_s29 = sshll.u32 %s420_s6, 4  ;;  %s2796_s4 = smov [#allocation10]   ;;  %s1779_s29 = int_to_ptr.vmem [resolvable:$true] %s1778_s29 }
  0x85   : > { %v3059_v11 = vld [vmem:[%s3025_s25 + $0x4] ss:$8 sps:$4 sm:$0xff]   ;;  %v2526_v12 = vld [vmem:[%s3033_s14 + $0x10] sm:$0xff]   ;;  %v3069_v18 = vld [vmem:[%s3025_s25] ss:$8 sps:$4 sm:$0xff]   ;;  %s2008_s21 = sshll.u32 %s3194_s11, 3 }
  0x86   : > { %819 = vmatprep.mubr.bf16.mxu0 %v3059_v11  ;;  %v2527_v13 = vld [vmem:[%s3033_s14 + $0x48] sm:$0xff]   ;;  %v2529_v15 = vld [vmem:[%s3033_s14 + $0x40] sm:$0xff]   ;;  %v2557_v17 = vld [vmem:[%s3025_s25 + $0xb4] ss:$8 sps:$4 sm:$0xff]   ;;  %s425_s23 = scalar_lea.vmem %s3459_s2, %s2008_s21  ;;  %s429_s10 = scalar_lea.vmem %s3460_s3, %s2008_s21 }
  0x87   : > { %2012 = vmatpush3.bf16.msra.mxu0 %v2518_v3  ;;  %2430 = vmatpush3.bf16.msra.mxu1 %v2518_v3  ;;  %v2528_v14 = vld [vmem:[%s3033_s14 + $0x8] sm:$0xff]   ;;  %v2530_v16 = vld [vmem:[%s3033_s14] sm:$0xff]   ;;  %v3072_v19 = vld [vmem:[%s3025_s25 + $0x14] ss:$8 sps:$4 sm:$0xff]   ;;  %s1765_s21 = scalar_lea.sflag [#allocation4], %s3021_s22  ;;  %s2709_s15 = scalar_lea.vmem %s1779_s29, 128 }
  0x88   : > { %2013 = vmatprep.subr.bf16.mxu0 %v2519_v4  ;;  %2423 = vmatprep.subr.bf16.mxu1 %v2519_v4  ;;  %v2555_v20 = vld [vmem:[%s3025_s25 + $0xb0] ss:$8 sps:$4 sm:$0xff]   ;;  %v2561_v21 = vld [vmem:[%s3025_s25 + $0xc4] ss:$8 sps:$4 sm:$0xff]   ;;  %v2563_v24 = vld [vmem:[%s3025_s25 + $0xc0] ss:$8 sps:$4 sm:$0xff]   ;;  %p2710_p10 = scmp.ne.s32.totalorder %s1779_s29, %s2709_s15 }
  0x89   : > { %907 = vmatprep.mubr.bf16.mxu1 %v2557_v17  ;;  %v3079_v22 = vld [vmem:[%s3025_s25 + $0x10] ss:$8 sps:$4 sm:$0xff]   ;;  %v3082_v23 = vld [vmem:[%s3025_s25 + $0x24] ss:$8 sps:$4 sm:$0xff]   ;;  %v3086_v27 = vld [vmem:[%s3025_s25 + $0xd4] ss:$8 sps:$4 sm:$0xff]  }
  0x8a   : > { %v2579_v25 = vld [vmem:[#allocation7 + $0x38] sm:$0xff]   ;;  %v2580_v26 = vld [vmem:[#allocation7 + $0x30] sm:$0xff]   ;;  %3506 = vst [vmem:[#allocation19_spill] sm:$0xff] %v3086_v27  ;;  %v2581_v28 = vld [vmem:[#allocation7 + $0x28] sm:$0xff]   ;;  %p2711_p11 = pnand %p2710_p10, %p3522_p3 }
  0x8b   : > { %2014 = vmatpush3.bf16.msra.mxu0 %v2520_v5  ;;  %2431 = vmatpush3.bf16.msra.mxu1 %v2520_v5  ;;  %v3091_v29 = vld [vmem:[%s3025_s25 + $0x20] ss:$8 sps:$4 sm:$0xff]   ;;  %v3095_v31 = vld [vmem:[%s3025_s25 + $0x34] ss:$8 sps:$4 sm:$0xff]   ;;  %v3098_v32 = vld [vmem:[%s3025_s25 + $0xd0] ss:$8 sps:$4 sm:$0xff]  }
  0x8c   : > { %2015 = vmatprep.subr.bf16.mxu0 %v2521_v6  ;;  %2424 = vmatprep.subr.bf16.mxu1 %v2521_v6  ;;  %v2582_v30 = vld [vmem:[#allocation7 + $0x20] sm:$0xff]   ;;  %3507 = vst [vmem:[#allocation20_spill] sm:$0xff] %v3098_v32  ;;  %v3108_v34 = vld [vmem:[%s3025_s25 + $0x30] ss:$8 sps:$4 sm:$0xff]   ;;  %v3117_v37 = vld [vmem:[%s3025_s25 + $0xf4] ss:$8 sps:$4 sm:$0xff]   ;;  %p2712_p9 = pneg %p2711_p11 }
  0x8d   : > { %v3101_v33 = vld [vmem:[%s3025_s25 + $0xe4] ss:$8 sps:$4 sm:$0xff]   ;;  %v3114_v36 = vld [vmem:[%s3025_s25 + $0xe0] ss:$8 sps:$4 sm:$0xff]   ;;  %3510 = vst [vmem:[#allocation23_spill] sm:$0xff] %v3117_v37  ;;  %v2583_v49 = vld [vmem:[#allocation7 + $0x18] sm:$0xff]  }
  0x8e   : > { %3508 = vst [vmem:[#allocation21_spill] sm:$0xff] %v3101_v33  ;;  %v3111_v35 = vld [vmem:[%s3025_s25 + $0x44] ss:$8 sps:$4 sm:$0xff]   ;;  %3509 = vst [vmem:[#allocation22_spill] sm:$0xff] %v3114_v36  ;;  %v3124_v38 = vld [vmem:[%s3025_s25 + $0x40] ss:$8 sps:$4 sm:$0xff]  }
  0x8f   : > { %2016 = vmatpush3.bf16.msra.mxu0 %v2522_v7  ;;  %2432 = vmatpush3.bf16.msra.mxu1 %v2522_v7  ;;  %v3127_v39 = vld [vmem:[%s3025_s25 + $0x54] ss:$8 sps:$4 sm:$0xff]   ;;  %v3130_v40 = vld [vmem:[%s3025_s25 + $0xf0] ss:$8 sps:$4 sm:$0xff]   ;;  %v3139_v42 = vld [vmem:[%s3025_s25 + $0x64] ss:$8 sps:$4 sm:$0xff]  }
  0x90   : > { %2017 = vmatprep.subr.bf16.mxu0 %v2523_v8  ;;  %2425 = vmatprep.subr.bf16.mxu1 %v2523_v8  ;;  %3511 = vst [vmem:[#allocation24_spill] sm:$0xff] %v3130_v40  ;;  %v3136_v41 = vld [vmem:[%s3025_s25 + $0x50] ss:$8 sps:$4 sm:$0xff]   ;;  %v3144_v43 = vld [vmem:[%s3025_s25 + $0x60] ss:$8 sps:$4 sm:$0xff]  }
  0x91   : > { %v3147_v44 = vld [vmem:[%s3025_s25 + $0x74] ss:$8 sps:$4 sm:$0xff]   ;;  %v3152_v45 = vld [vmem:[%s3025_s25 + $0x70] ss:$8 sps:$4 sm:$0xff]   ;;  %v3155_v46 = vld [vmem:[%s3025_s25 + $0x84] ss:$8 sps:$4 sm:$0xff]  }
  0x92   : > { %v3160_v47 = vld [vmem:[%s3025_s25 + $0x80] ss:$8 sps:$4 sm:$0xff]   ;;  %v3163_v48 = vld [vmem:[%s3025_s25 + $0x94] ss:$8 sps:$4 sm:$0xff]   ;;  %v3168_v50 = vld [vmem:[%s3025_s25 + $0x90] ss:$8 sps:$4 sm:$0xff]  }
  0x93   : > { %2018 = vmatpush3.bf16.msra.mxu0 %v2524_v9  ;;  %2433 = vmatpush3.bf16.msra.mxu1 %v2524_v9  ;;  %v3171_v51 = vld [vmem:[%s3025_s25 + $0xa4] ss:$8 sps:$4 sm:$0xff]   ;;  %v2584_v52 = vld [vmem:[#allocation7 + $0x10] sm:$0xff]   ;;  %v3176_v54 = vld [vmem:[%s3025_s25 + $0xa0] ss:$8 sps:$4 sm:$0xff]  }
  0x94   : > { %2019 = vmatprep.subr.bf16.mxu0 %v2525_v10  ;;  %2426 = vmatprep.subr.bf16.mxu1 %v2525_v10  ;;  %3512 = vst [vmem:[#allocation25_spill] sm:$0xff] %v3171_v51  ;;  %v2585_v53 = vld [vmem:[#allocation7 + $0x8] sm:$0xff]   ;;  %3513 = vst [vmem:[#allocation26_spill] sm:$0xff] %v3176_v54  ;;  %v2586_v55 = vld [vmem:[#allocation7] sm:$0xff]  }
  0x97   : > { %2020 = vmatpush3.bf16.msra.mxu0 %v2526_v12  ;;  %2434 = vmatpush3.bf16.msra.mxu1 %v2526_v12 }
  0x98   : > { %2021 = vmatprep.subr.bf16.mxu0 %v2527_v13  ;;  %2427 = vmatprep.subr.bf16.mxu1 %v2527_v13 }
  0x9b   : > { %2022 = vmatpush3.bf16.msra.mxu0 %v2528_v14  ;;  %2435 = vmatpush3.bf16.msra.mxu1 %v2528_v14 }
  0x9c   : > { %2023 = vmatprep.subr.bf16.mxu0 %v2529_v15  ;;  %2428 = vmatprep.subr.bf16.mxu1 %v2529_v15 }
  0x9f   : > { %2024 = vmatpush3.bf16.msra.mxu0 %v2530_v16  ;;  %2436 = vmatpush3.bf16.msra.mxu1 %v2530_v16 }
  0xa0   : > { %2325 = vmatprep.subr.bf16.mxu1 %v2579_v25 }
  0xa2   : > { %820 = vmatmul.mubr.bf16.vlgmr.msra.gmra.mxu0 %v3069_v18  ;;  %908 = vmatmul.mubr.bf16.vlgmr.msra.gmra.mxu1 %v2555_v20 }
  0xa3   : > { %827 = vmatprep.mubr.bf16.mxu0 %v3072_v19  ;;  %915 = vmatprep.mubr.bf16.mxu1 %v2561_v21 }
  0xa4   : > { %2326 = vmatpush3.bf16.msra.mxu1 %v2579_v25 }
  0xa5   : > { %2327 = vmatprep.subr.bf16.mxu1 %v2580_v26 }
  0xa8   : > { %2328 = vmatpush3.bf16.msra.mxu1 %v2580_v26 }
  0xa9   : > { %2329 = vmatprep.subr.bf16.mxu1 %v2581_v28 }
  0xaa   : > { %828 = vmatmul.mubr.bf16.gmra.mxu0 %v3079_v22  ;;  %916 = vmatmul.mubr.bf16.gmra.mxu1 %v2563_v24 }
  0xab   : > { %835 = vmatprep.mubr.bf16.mxu0 %v3082_v23  ;;  %923 = vmatprep.mubr.bf16.mxu1 %v3086_v27 }
  0xac   : > { %2330 = vmatpush3.bf16.msra.mxu1 %v2581_v28 }
  0xad   : > { %2331 = vmatprep.subr.bf16.mxu1 %v2582_v30 }
  0xb0   : > { %2332 = vmatpush3.bf16.msra.mxu1 %v2582_v30 }
  0xb1   : > { %2333 = vmatprep.subr.bf16.mxu1 %v2583_v49 }
  0xb2   : > { %836 = vmatmul.mubr.bf16.gmra.mxu0 %v3091_v29  ;;  %924 = vmatmul.mubr.bf16.gmra.mxu1 %v3098_v32 }
  0xb3   : > { %843 = vmatprep.mubr.bf16.mxu0 %v3095_v31  ;;  %931 = vmatprep.mubr.bf16.mxu1 %v3101_v33 }
  0xb4   : > { %2334 = vmatpush3.bf16.msra.mxu1 %v2583_v49 }
  0xb5   : > { %2335 = vmatprep.subr.bf16.mxu1 %v2584_v52 }
  0xb8   : > { %2336 = vmatpush3.bf16.msra.mxu1 %v2584_v52 }
  0xb9   : > { %2337 = vmatprep.subr.bf16.mxu1 %v2585_v53 }
  0xba   : > { %844 = vmatmul.mubr.bf16.gmra.mxu0 %v3108_v34  ;;  %932 = vmatmul.mubr.bf16.gmra.mxu1 %v3114_v36 }
  0xbb   : > { %851 = vmatprep.mubr.bf16.mxu0 %v3111_v35  ;;  %939 = vmatprep.mubr.bf16.mxu1 %v3117_v37 }
  0xbc   : > { %2338 = vmatpush3.bf16.msra.mxu1 %v2585_v53 }
  0xbd   : > { %2339 = vmatprep.subr.bf16.mxu1 %v2586_v55 }
  0xc0   : > { %2340 = vmatpush3.bf16.msra.mxu1 %v2586_v55 }
  0xc2   : > { %852 = vmatmul.mubr.bf16.gmra.mxu0 %v3124_v38  ;;  %940 = vmatmul.mubr.bf16.gmra.mxu1 %v3130_v40 }
  0xc3   : > { %859 = vmatprep.mubr.bf16.mxu0 %v3127_v39 }
  0xca   : > { %860 = vmatmul.mubr.bf16.gmra.mxu0 %v3136_v41 }
  0xcb   : > { %867 = vmatprep.mubr.bf16.mxu0 %v3139_v42 }
  0xd2   : > { %868 = vmatmul.mubr.bf16.gmra.mxu0 %v3144_v43 }
  0xd3   : > { %875 = vmatprep.mubr.bf16.mxu0 %v3147_v44 }
  0xda   : > { %876 = vmatmul.mubr.bf16.gmra.mxu0 %v3152_v45 }
  0xdb   : > { %883 = vmatprep.mubr.bf16.mxu0 %v3155_v46 }
  0xe2   : > { %884 = vmatmul.mubr.bf16.gmra.mxu0 %v3160_v47 }
  0xe3   : > { %891 = vmatprep.mubr.bf16.mxu0 %v3163_v48 }
  0xea   : > { %892 = vmatmul.mubr.bf16.gmra.mxu0 %v3168_v50 }
  0xeb   : > { %899 = vmatprep.mubr.bf16.mxu0 %v3171_v51 }
  0xf2   : > { %900 = vmatmul.mubr.bf16.gmra.mxu0 %v3176_v54 }
  0xf3   : > { %1543 = vmatprep.mubr.bf16.mxu0 %v3059_v11 }
 0x162   : > { %v2025_v56 = vpop.f32.mrf.mxu0  ;;  %v3180_v12 = vpop.f32.mrf.mxu1 }
 0x164   : > { %v2026_v57 = vpop.f32.mrf.mxu0  ;;  %v3182_v16 = vpop.f32.mrf.mxu1 }
 0x165   : > { %v2027_v60 = vadd.f32 %v2026_v57, %v2025_v56 }
 0x166   : > { %v2028_v58 = vpop.f32.mrf.mxu0  ;;  %v3184_v25 = vpop.f32.mrf.mxu1 }
 0x168   : > { %v2029_v59 = vpop.f32.mrf.mxu0  ;;  %v3186_v49 = vpop.f32.mrf.mxu1 }
 0x169   : > { %v2030_v61 = vadd.f32 %v2029_v59, %v2028_v58 }
 0x16a   : > { %v2031_v62 = vpop.f32.mrf.mxu0  ;;  %v2097_v57 = vpop.f32.mrf.mxu1 }
 0x16b   : > { %v948_v63 = vpack.c.bf16 %v2030_v61, %v2027_v60 }
 0x16c   : > { %v2032_v0 = vpop.f32.mrf.mxu0  ;;  %v2098_v61 = vpop.f32.mrf.mxu1 }
 0x16d   : > { %2341 = vmatprep.mubr.bf16.mxu1 %v948_v63  ;;  %v2033_v3 = vadd.f32 %v2032_v0, %v2031_v62 }
 0x16e   : > { %v2034_v1 = vpop.f32.mrf.mxu0 }
 0x170   : > { %v2035_v2 = vpop.f32.mrf.mxu0 }
 0x171   : > { %v2036_v4 = vadd.f32 %v2035_v2, %v2034_v1  ;;  %v2100_v2 = vpop.f32.mrf.mxu1 }
 0x172   : > { %v2037_v5 = vpop.f32.mrf.mxu0 }
 0x173   : > { %v949_v6 = vpack.c.bf16 %v2036_v4, %v2033_v3 }
 0x174   : > { %v2038_v7 = vpop.f32.mrf.mxu0 }
 0x175   : > { %2342 = vmatmul.mubr.bf16.vlgmr.msra.gmra.mxu1 %v949_v6  ;;  %v2039_v10 = vadd.f32 %v2038_v7, %v2037_v5  ;;  %v2101_v6 = vpop.f32.mrf.mxu1 }
 0x176   : > { %v2040_v8 = vpop.f32.mrf.mxu0 }
 0x178   : > { %v2041_v9 = vpop.f32.mrf.mxu0 }
 0x179   : > { %v2042_v11 = vadd.f32 %v2041_v9, %v2040_v8 }
 0x17a   : > { %v2043_v13 = vpop.f32.mrf.mxu0 }
 0x17b   : > { %v950_v14 = vpack.c.bf16 %v2042_v11, %v2039_v10  ;;  %v2103_v11 = vpop.f32.mrf.mxu1 }
 0x17c   : > { %v2044_v15 = vpop.f32.mrf.mxu0 }
 0x17d   : > { %2345 = vmatprep.mubr.bf16.mxu1 %v950_v14  ;;  %v2045_v21 = vadd.f32 %v2044_v15, %v2043_v13 }
 0x17e   : > { %v2046_v17 = vpop.f32.mrf.mxu0 }
 0x180   : > { %v2047_v20 = vpop.f32.mrf.mxu0 }
 0x181   : > { %v2048_v24 = vadd.f32 %v2047_v20, %v2046_v17  ;;  %v2104_v17 = vpop.f32.mrf.mxu1 }
 0x182   : > { %v2049_v26 = vpop.f32.mrf.mxu0 }
 0x183   : > { %v951_v28 = vpack.c.bf16 %v2048_v24, %v2045_v21 }
 0x184   : > { %v2050_v30 = vpop.f32.mrf.mxu0 }
 0x185   : > { %2346 = vmatmul.mubr.bf16.gmra.mxu1 %v951_v28  ;;  %v2051_v55 = vadd.f32 %v2050_v30, %v2049_v26  ;;  %v2106_v28 = vpop.f32.mrf.mxu1 }
 0x186   : > { %v2052_v52 = vpop.f32.mrf.mxu0 }
 0x188   : > { %v2053_v53 = vpop.f32.mrf.mxu0 }
 0x189   : > { %v2054_v56 = vadd.f32 %v2053_v53, %v2052_v52 }
 0x18a   : > { %v2055_v58 = vpop.f32.mrf.mxu0 }
 0x18b   : > { %v952_v59 = vpack.c.bf16 %v2054_v56, %v2051_v55  ;;  %v2107_v55 = vpop.f32.mrf.mxu1 }
 0x18c   : > { %v2056_v60 = vpop.f32.mrf.mxu0 }
 0x18d   : > { %2349 = vmatprep.mubr.bf16.mxu1 %v952_v59  ;;  %v2057_v0 = vadd.f32 %v2056_v60, %v2055_v58 }
 0x18e   : > { %v2058_v62 = vpop.f32.mrf.mxu0 }
 0x190   : > { %v2059_v63 = vpop.f32.mrf.mxu0 }
 0x191   : > { %v2060_v1 = vadd.f32 %v2059_v63, %v2058_v62  ;;  %v2109_v62 = vpop.f32.mrf.mxu1 }
 0x192   : > { %v2061_v3 = vpop.f32.mrf.mxu0 }
 0x193   : > { %v953_v4 = vpack.c.bf16 %v2060_v1, %v2057_v0 }
 0x194   : > { %v2062_v5 = vpop.f32.mrf.mxu0 }
 0x195   : > { %2350 = vmatmul.mubr.bf16.gmra.mxu1 %v953_v4  ;;  %v2063_v9 = vadd.f32 %v2062_v5, %v2061_v3  ;;  %v2110_v3 = vpop.f32.mrf.mxu1 }
 0x196   : > { %v2064_v7 = vpop.f32.mrf.mxu0 }
 0x198   : > { %v2065_v8 = vpop.f32.mrf.mxu0 }
 0x199   : > { %v2066_v10 = vadd.f32 %v2065_v8, %v2064_v7 }
 0x19a   : > { %v2067_v13 = vpop.f32.mrf.mxu0 }
 0x19b   : > { %v954_v14 = vpack.c.bf16 %v2066_v10, %v2063_v9  ;;  %v2112_v9 = vpop.f32.mrf.mxu1 }
 0x19c   : > { %v2068_v15 = vpop.f32.mrf.mxu0 }
 0x19d   : > { %2353 = vmatprep.mubr.bf16.mxu1 %v954_v14  ;;  %v2069_v24 = vadd.f32 %v2068_v15, %v2067_v13  ;;  %v2113_v15 = vpop.f32.mrf.mxu1 }
 0x19e   : > { %v2070_v20 = vpop.f32.mrf.mxu0 }
 0x1a0   : > { %v2071_v21 = vpop.f32.mrf.mxu0 }
 0x1a1   : > { %v2072_v26 = vadd.f32 %v2071_v21, %v2070_v20  ;;  %v2093_v21 = vadd.f32 %v3182_v16, %v3180_v12  ;;  %v2108_v12 = vadd.f32 %v2107_v55, %v2106_v28  ;;  %v2111_v16 = vadd.f32 %v2110_v3, %v2109_v62  ;;  %v3207_v28 = vld [vmem:[%s425_s23] sm:$0xff] }
 0x1a2   : > { %v2073_v30 = vpop.f32.mrf.mxu0  ;;  %v3211_v55 = vcombine.high %v3207_v28, %v3207_v28 }
 0x1a3   : > { %v955_v52 = vpack.c.bf16 %v2072_v26, %v2069_v24  ;;  %v2096_v24 = vadd.f32 %v3186_v49, %v3184_v25 }
 0x1a4   : > { %v2074_v53 = vpop.f32.mrf.mxu0 }
 0x1a5   : > { %2354 = vmatmul.mubr.bf16.gmra.mxu1 %v955_v52  ;;  %v2075_v59 = vadd.f32 %v2074_v53, %v2073_v30  ;;  %v2099_v30 = vadd.f32 %v2098_v61, %v2097_v57  ;;  %v2102_v52 = vadd.f32 %v2101_v6, %v2100_v2 }
 0x1a6   : > { %v2076_v56 = vpop.f32.mrf.mxu0 }
 0x1a8   : > { %v2077_v58 = vpop.f32.mrf.mxu0 }
 0x1a9   : > { %v2078_v60 = vadd.f32 %v2077_v58, %v2076_v56  ;;  %v2115_v58 = vpop.f32.mrf.mxu1 }
 0x1aa   : > { %v2079_v63 = vpop.f32.mrf.mxu0 }
 0x1ab   : > { %v956_v0 = vpack.c.bf16 %v2078_v60, %v2075_v59  ;;  %v959_v60 = vpack.c.bf16 %v2096_v24, %v2093_v21 }
 0x1ac   : > { %v2080_v1 = vpop.f32.mrf.mxu0 }
 0x1ad   : > { %2357 = vmatprep.mubr.bf16.mxu1 %v956_v0  ;;  %v2081_v7 = vadd.f32 %v2080_v1, %v2079_v63  ;;  %v960_v63 = vpack.c.bf16 %v2102_v52, %v2099_v30  ;;  %v2116_v0 = vpop.f32.mrf.mxu1  ;;  %v2105_v1 = vadd.f32 %v2104_v17, %v2103_v11  ;;  %v3205_v17 = vld [vmem:[%s3462_s5] ss:$0 sm:$0xff] }
 0x1ae   : > { %v2082_v4 = vpop.f32.mrf.mxu0  ;;  %v2117_v2 = vadd.f32 %v2116_v0, %v2115_v58 }
 0x1af   : > { %v2118_v25 = vpop.f32.mrf.mxu1  ;;  %v961_v49 = vpack.c.bf16 %v2108_v12, %v2105_v1 }
 0x1b0   : > { %v2083_v5 = vpop.f32.mrf.mxu0 }
 0x1b1   : > { %v2084_v8 = vadd.f32 %v2083_v5, %v2082_v4  ;;  %v2114_v4 = vadd.f32 %v2113_v15, %v2112_v9  ;;  %v2119_v61 = vpop.f32.mrf.mxu1 }
 0x1b2   : > { %v2085_v10 = vpop.f32.mrf.mxu0  ;;  %v2120_v6 = vadd.f32 %v2119_v61, %v2118_v25 }
 0x1b3   : > { %v957_v13 = vpack.c.bf16 %v2084_v8, %v2081_v7  ;;  %v962_v57 = vpack.c.bf16 %v2114_v4, %v2111_v16 }
 0x1b4   : > { %v2086_v14 = vpop.f32.mrf.mxu0  ;;  %v963_v5 = vpack.c.bf16 %v2120_v6, %v2117_v2 }
 0x1b5   : > { %2358 = vmatmul.mubr.bf16.gmra.mxu1 %v957_v13  ;;  %v2087_v53 = vadd.f32 %v2086_v14, %v2085_v10 }
 0x1b6   : > { %v2088_v20 = vpop.f32.mrf.mxu0 }
 0x1b8   : > { %v2089_v26 = vpop.f32.mrf.mxu0 }
 0x1b9   : > { %v2090_v56 = vadd.f32 %v2089_v26, %v2088_v20 }
 0x1bb   : > { %v958_v59 = vpack.c.bf16 %v2090_v56, %v2087_v53 }
 0x1bd   : > { %2361 = vmatprep.mubr.bf16.mxu1 %v958_v59 }
 0x1be   : > { %2362 = vmatmul.mubr.bf16.gmra.mxu1 %v959_v60 }
 0x1bf   : > { %2365 = vmatprep.mubr.bf16.mxu1 %v960_v63 }
 0x1c6   : > { %2366 = vmatmul.mubr.bf16.gmra.mxu1 %v961_v49 }
 0x1c7   : > { %2369 = vmatprep.mubr.bf16.mxu1 %v962_v57 }
 0x1ce   : > { %2370 = vmatmul.mubr.bf16.gmra.mxu1 %v963_v5 }
 0x1cf   : > { %1266 = vmatprep.mubr.bf16.mxu1 %v3211_v55 }
 0x235   : > { %v2343_v11 = vpop.f32.mrf.mxu1 }
 0x236   : > { %v1061_v3 = vadd.f32 %v2343_v11, %v3205_v17 }
 0x237   : > { %v1052_v62 = vpop.f32.mrf.mxu1 }
 0x238   : > { %v1053_v8 = vadd.f32 %v3205_v17, %v1052_v62  ;;  %v1181_v13 = vmax.f32 %v1061_v3, 0.0 }
 0x239   : > { %v2344_v7 = vpop.f32.mrf.mxu1 }
 0x23a   : > { %v1064_v9 = vadd.f32 %v2344_v7, %v3205_v17  ;;  %v1179_v20 = vmax.f32 %v1053_v8, 0.0 }
 0x23b   : > { %v1055_v10 = vpop.f32.mrf.mxu1 }
 0x23c   : > { %v1182_v14 = vmax.f32 %v1064_v9, 0.0  ;;  %v1056_v15 = vadd.f32 %v3205_v17, %v1055_v10  ;;  %v2795_v10 = vmov 0  }
 0x23d   : > { %2514 = vset.pattern.permute.xlu0 %v2795_v10 }
 0x23e   : > { %v3218_v21 = vpack.c.bf16 %v1182_v14, %v1181_v13  ;;  %v1180_v24 = vmax.f32 %v1056_v15, 0.0  ;;  %v496_v15 = vld [vmem:[%s429_s10] sm:$0xff] }
 0x23f   : > { %1276 = vperm.xlu0 %2514, %v496_v15  }
 0x240   : > { %v3220_v26 = vpack.c.bf16 %v1180_v24, %v1179_v20 }
 0x245   : > { %v2347_v30 = vpop.f32.mrf.mxu1 }
 0x246   : > { %v1077_v53 = vadd.f32 %v2347_v30, %v3205_v17 }
 0x247   : > { %v1068_v52 = vpop.f32.mrf.mxu1 }
 0x248   : > { %v1069_v58 = vadd.f32 %v3205_v17, %v1068_v52  ;;  %v1185_v63 = vmax.f32 %v1077_v53, 0.0 }
 0x249   : > { %v2348_v56 = vpop.f32.mrf.mxu1 }
 0x24a   : > { %v1080_v59 = vadd.f32 %v2348_v56, %v3205_v17  ;;  %v1183_v12 = vmax.f32 %v1069_v58, 0.0 }
 0x24b   : > { %v1071_v60 = vpop.f32.mrf.mxu1 }
 0x24c   : > { %v1186_v0 = vmax.f32 %v1080_v59, 0.0  ;;  %v1072_v1 = vadd.f32 %v3205_v17, %v1071_v60 }
 0x24e   : > { %v3226_v16 = vpack.c.bf16 %v1186_v0, %v1185_v63  ;;  %v1184_v4 = vmax.f32 %v1072_v1, 0.0 }
 0x250   : > { %v3228_v25 = vpack.c.bf16 %v1184_v4, %v1183_v12 }
 0x255   : > { %v2351_v49 = vpop.f32.mrf.mxu1 }
 0x257   : > { %v3230_v57 = vpop.f32.mrf.mxu1 }
 0x259   : > { %v2352_v61 = vpop.f32.mrf.mxu1 }
 0x25b   : > { %v1087_v2 = vpop.f32.mrf.mxu1 }
 0x265   : > { %v2355_v6 = vpop.f32.mrf.mxu1 }
 0x266   : > { %v1109_v0 = vadd.f32 %v2355_v6, %v3205_v17 }
 0x267   : > { %v1100_v5 = vpop.f32.mrf.mxu1 }
 0x268   : > { %v1193_v32 = vmax.f32 %v1109_v0, 0.0 }
 0x269   : > { %v2356_v11 = vpop.f32.mrf.mxu1 }
 0x26a   : > { %v1112_v59 = vadd.f32 %v2356_v11, %v3205_v17 }
 0x26b   : > { %v1103_v62 = vpop.f32.mrf.mxu1 }
 0x26c   : > { %v1194_v10 = vmax.f32 %v1112_v59, 0.0  ;;  %v1104_v15 = vadd.f32 %v3205_v17, %v1103_v62  ;;  %v1096_v59 = vadd.f32 %v2352_v61, %v3205_v17  ;;  %v1088_v61 = vadd.f32 %v3205_v17, %v1087_v2 }
 0x26e   : > { %v1192_v62 = vmax.f32 %v1104_v15, 0.0  ;;  %v1188_v2 = vmax.f32 %v1088_v61, 0.0  ;;  %v2592_v61 = vld [vmem:[#allocation8 + $0x20] sm:$0xff]  }
 0x275   : > { %v3232_v3 = vpop.f32.mrf.mxu1 }
 0x277   : > { %v3234_v7 = vpop.f32.mrf.mxu1 }
 0x279   : > { %v3236_v8 = vpop.f32.mrf.mxu1 }
 0x27b   : > { %v3238_v9 = vpop.f32.mrf.mxu1 }
 0x27e   : > { %v2363_v13 = vpop.f32.mrf.mxu1 }
 0x280   : > { %v3240_v14 = vpop.f32.mrf.mxu1 }
 0x282   : > { %v2364_v20 = vpop.f32.mrf.mxu1 }
 0x284   : > { %v1135_v24 = vpop.f32.mrf.mxu1 }
 0x286   : > { %v2367_v30 = vpop.f32.mrf.mxu1 }
 0x287   : > { %v1157_v6 = vadd.f32 %v2367_v30, %v3205_v17 }
 0x288   : > { %v1148_v52 = vpop.f32.mrf.mxu1 }
 0x28a   : > { %v2368_v53 = vpop.f32.mrf.mxu1 }
 0x28b   : > { %v1160_v37 = vadd.f32 %v2368_v53, %v3205_v17 }
 0x28c   : > { %v1151_v56 = vpop.f32.mrf.mxu1 }
 0x28d   : > { %v1206_v51 = vmax.f32 %v1160_v37, 0.0  ;;  %v1152_v53 = vadd.f32 %v3205_v17, %v1151_v56 }
 0x28e   : > { %v2371_v58 = vpop.f32.mrf.mxu1 }
 0x28f   : > { %v1173_v63 = vadd.f32 %v2371_v58, %v3205_v17  ;;  %v1101_v58 = vadd.f32 %v3205_v17, %v1100_v5  ;;  %v1204_v56 = vmax.f32 %v1152_v53, 0.0  ;;  %v1120_v53 = vadd.f32 %v3205_v17, %v3238_v9 }
 0x290   : > { %v1164_v60 = vpop.f32.mrf.mxu1  ;;  %v3303_v9 = vcombine.low %v3207_v28, %v3207_v28  ;;  %v2594_v28 = vld [vmem:[#allocation8 + $0x10] sm:$0xff]  }
 0x291   : > { %v1165_v12 = vadd.f32 %v3205_v17, %v1164_v60  ;;  %v1209_v36 = vmax.f32 %v1173_v63, 0.0  ;;  %v1191_v5 = vmax.f32 %v1101_v58, 0.0  ;;  %v1128_v58 = vadd.f32 %v3236_v8, %v3205_v17 }
 0x292   : > { %v2372_v1 = vpop.f32.mrf.mxu1 }
 0x293   : > { %v1176_v4 = vadd.f32 %v2372_v1, %v3205_v17  ;;  %v1207_v27 = vmax.f32 %v1165_v12, 0.0  ;;  %v3260_v1 = vpack.c.bf16 %v1194_v10, %v1193_v32  ;;  %v1190_v32 = vmax.f32 %v1096_v59, 0.0 }
 0x294   : > { %v1167_v40 = vpop.f32.mrf.mxu1  ;;  %v3271_v37 = vpack.c.bf16 %v1192_v62, %v1191_v5  ;;  %v1198_v62 = vmax.f32 %v1128_v58, 0.0  ;;  %v1117_v5 = vadd.f32 %v3205_v17, %v3234_v7  ;;  %v2591_v7 = vld [vmem:[#allocation8 + $0x28] sm:$0xff]  }
 0x295   : > { %v1210_v33 = vmax.f32 %v1176_v4, 0.0  ;;  %v1168_v11 = vadd.f32 %v3205_v17, %v1167_v40  ;;  %v1093_v40 = vadd.f32 %v2351_v49, %v3205_v17  ;;  %v1085_v49 = vadd.f32 %v3205_v17, %v3230_v57 }
 0x296   : > { %v1133_v57 = vadd.f32 %v3205_v17, %v3240_v14 }
 0x297   : > { %v3257_v54 = vpack.c.bf16 %v1210_v33, %v1209_v36  ;;  %v1208_v60 = vmax.f32 %v1168_v11, 0.0  ;;  %v1205_v33 = vmax.f32 %v1157_v6, 0.0  ;;  %v1149_v36 = vadd.f32 %v3205_v17, %v1148_v52 }
 0x298   : > { %v1189_v0 = vmax.f32 %v1093_v40, 0.0  ;;  %v1141_v52 = vadd.f32 %v2363_v13, %v3205_v17  ;;  %v1187_v15 = vmax.f32 %v1085_v49, 0.0  ;;  %v1199_v59 = vmax.f32 %v1133_v57, 0.0 }
 0x299   : > { %v3263_v63 = vpack.c.bf16 %v1208_v60, %v1207_v27  ;;  %2145 = vmatprep.subr.bf16.mxu1 %v3257_v54  ;;  %v1144_v27 = vadd.f32 %v2364_v20, %v3205_v17  ;;  %v3274_v30 = vpack.c.bf16 %v1206_v51, %v1205_v33  ;;  %v1203_v12 = vmax.f32 %v1149_v36, 0.0 }
 0x29a   : > { %2146 = vmatpush3.bf16.msra.mxu1 %v3260_v1  ;;  %v3281_v4 = vpack.c.bf16 %v1190_v32, %v1189_v0  ;;  %v1136_v20 = vadd.f32 %v3205_v17, %v1135_v24  ;;  %v1201_v11 = vmax.f32 %v1141_v52, 0.0  ;;  %v1215_v13 = vpack.c.bf16 %v1188_v2, %v1187_v15  ;;  %v2589_v32 = vld [vmem:[#allocation8 + $0x38] sm:$0xff]   ;;  %v2596_v0 = vld [vmem:[#allocation8] sm:$0xff]  }
 0x29b   : > { %2147 = vmatprep.subr.bf16.mxu1 %v3263_v63  ;;  %v1202_v10 = vmax.f32 %v1144_v27, 0.0  ;;  %v3284_v51 = vpack.c.bf16 %v1204_v56, %v1203_v12  ;;  %v1125_v24 = vadd.f32 %v3232_v3, %v3205_v17  ;;  %v1196_v33 = vmax.f32 %v1120_v53, 0.0  ;;  %v2590_v17 = vld [vmem:[#allocation8 + $0x30] sm:$0xff]   ;;  %v2593_v27 = vld [vmem:[#allocation8 + $0x18] sm:$0xff]   ;;  %v2595_v56 = vld [vmem:[#allocation8 + $0x8] sm:$0xff]  }
 0x29c   : > { %v1200_v60 = vmax.f32 %v1136_v20, 0.0  ;;  %v1195_v36 = vmax.f32 %v1117_v5, 0.0 }
 0x29d   : > { %v1222_v6 = vpack.c.bf16 %v1202_v10, %v1201_v11  ;;  %v1197_v14 = vmax.f32 %v1125_v24, 0.0 }
 0x29e   : > { %2148 = vmatpush3.bf16.msra.mxu1 %v3271_v37  ;;  %v1221_v40 = vpack.c.bf16 %v1200_v60, %v1199_v59  ;;  %v1219_v3 = vpack.c.bf16 %v1196_v33, %v1195_v36 }
 0x29f   : > { %2149 = vmatprep.subr.bf16.mxu1 %v3274_v30  ;;  %v1220_v8 = vpack.c.bf16 %v1198_v62, %v1197_v14 }
 0x2a2   : > { %2150 = vmatpush3.bf16.msra.mxu1 %v3281_v4 }
 0x2a3   : > { %2151 = vmatprep.subr.bf16.mxu1 %v3284_v51 }
 0x2a6   : > { %2152 = vmatpush3.bf16.msra.mxu1 %v1215_v13 }
 0x2a7   : > { %2153 = vmatprep.subr.bf16.mxu1 %v1222_v6 }
 0x2aa   : > { %2154 = vmatpush3.bf16.msra.mxu1 %v3226_v16 }
 0x2ab   : > { %2155 = vmatprep.subr.bf16.mxu1 %v1221_v40 }
 0x2ae   : > { %2156 = vmatpush3.bf16.msra.mxu1 %v3228_v25 }
 0x2af   : > { %2157 = vmatprep.subr.bf16.mxu1 %v1220_v8 }
 0x2b2   : > { %2158 = vmatpush3.bf16.msra.mxu1 %v3218_v21 }
 0x2b3   : > { %2159 = vmatprep.subr.bf16.mxu1 %v1219_v3 }
 0x2b6   : > { %2160 = vmatpush3.bf16.msra.mxu1 %v3220_v26 }
 0x2b7   : > { %2373 = vmatprep.subr.bf16.mxu1 %v2589_v32 }
 0x2b9   : > { %1267 = vmatmul.mubr.bf16.vlgmr.msra.gmra.mxu1 %v3303_v9 }
 0x2ba   : > { %2374 = vmatpush3.bf16.msra.mxu1 %v2589_v32  ;;  %2389 = vmatprep.mubr.bf16.mxu1 %v3220_v26 }
 0x2bb   : > { %2375 = vmatprep.subr.bf16.mxu1 %v2590_v17 }
 0x2be   : > { %2376 = vmatpush3.bf16.msra.mxu1 %v2590_v17 }
 0x2bf   : > { %2377 = vmatprep.subr.bf16.mxu1 %v2591_v7 }
 0x2c2   : > { %2378 = vmatpush3.bf16.msra.mxu1 %v2591_v7 }
 0x2c3   : > { %2379 = vmatprep.subr.bf16.mxu1 %v2592_v61 }
 0x2c6   : > { %2380 = vmatpush3.bf16.msra.mxu1 %v2592_v61 }
 0x2c7   : > { %2381 = vmatprep.subr.bf16.mxu1 %v2593_v27 }
 0x2ca   : > { %2382 = vmatpush3.bf16.msra.mxu1 %v2593_v27 }
 0x2cb   : > { %2383 = vmatprep.subr.bf16.mxu1 %v2594_v28 }
 0x2ce   : > { %2384 = vmatpush3.bf16.msra.mxu1 %v2594_v28 }
 0x2cf   : > { %2385 = vmatprep.subr.bf16.mxu1 %v2595_v56 }
 0x2d2   : > { %2386 = vmatpush3.bf16.msra.mxu1 %v2595_v56 }
 0x2d3   : > { %2387 = vmatprep.subr.bf16.mxu1 %v2596_v0 }
 0x2d6   : > { %2388 = vmatpush3.bf16.msra.mxu1 %v2596_v0 }
 0x2d9   : > { %2390 = vmatmul.mubr.bf16.vlgmr.msra.gmra.mxu1 %v3218_v21 }
 0x2da   : > { %2393 = vmatprep.mubr.bf16.mxu1 %v3228_v25 }
 0x2e1   : > { %2394 = vmatmul.mubr.bf16.gmra.mxu1 %v3226_v16 }
 0x2e2   : > { %2397 = vmatprep.mubr.bf16.mxu1 %v1215_v13 }
 0x2e9   : > { %2398 = vmatmul.mubr.bf16.gmra.mxu1 %v3281_v4 }
 0x2ea   : > { %2401 = vmatprep.mubr.bf16.mxu1 %v3271_v37 }
 0x2f1   : > { %2402 = vmatmul.mubr.bf16.gmra.mxu1 %v3260_v1 }
 0x2f2   : > { %2405 = vmatprep.mubr.bf16.mxu1 %v1219_v3 }
 0x2f9   : > { %2406 = vmatmul.mubr.bf16.gmra.mxu1 %v1220_v8 }
 0x2fa   : > { %2409 = vmatprep.mubr.bf16.mxu1 %v1221_v40 }
 0x301   : > { %2410 = vmatmul.mubr.bf16.gmra.mxu1 %v1222_v6 }
 0x302   : > { %2413 = vmatprep.mubr.bf16.mxu1 %v3284_v51 }
 0x309   : > { %2414 = vmatmul.mubr.bf16.gmra.mxu1 %v3274_v30 }
 0x30a   : > { %2417 = vmatprep.mubr.bf16.mxu1 %v3263_v63 }
 0x311   : > { %2418 = vmatmul.mubr.bf16.gmra.mxu1 %v3257_v54 }
 0x312   : > { %1752 = vmatprep.mubr.bf16.mxu1 %v3211_v55 }
 0x379   : > { %v2161_v21 = vpop.f32.mrf.mxu1 }
 0x37b   : > { %v2162_v26 = vpop.f32.mrf.mxu1 }
 0x37c   : > { %v3319_v16 = vadd.f32 %v2162_v26, %v2161_v21 }
 0x37d   : > { %v2164_v25 = vpop.f32.mrf.mxu1 }
 0x37f   : > { %v2165_v1 = vpop.f32.mrf.mxu1 }
 0x399   : > { %v2391_v37 = vpop.f32.mrf.mxu1 }
 0x39b   : > { %v1362_v49 = vpop.f32.mrf.mxu1 }
 0x39d   : > { %v2392_v52 = vpop.f32.mrf.mxu1 }
 0x39e   : > { %v1490_v12 = vpack.c.bf16 %v2392_v52, %v2391_v37 }
 0x39f   : > { %v1365_v4 = vpop.f32.mrf.mxu1 }
 0x3a0   : > { %v1489_v2 = vpack.c.bf16 %v1365_v4, %v1362_v49 }
 0x3a1   : > { %v2395_v10 = vpop.f32.mrf.mxu1 }
 0x3a3   : > { %v1378_v30 = vpop.f32.mrf.mxu1 }
 0x3a5   : > { %v2396_v20 = vpop.f32.mrf.mxu1 }
 0x3a6   : > { %v1492_v63 = vpack.c.bf16 %v2396_v20, %v2395_v10 }
 0x3a7   : > { %v1381_v51 = vpop.f32.mrf.mxu1 }
 0x3a8   : > { %v1491_v54 = vpack.c.bf16 %v1381_v51, %v1378_v30 }
 0x3a9   : > { %v2399_v15 = vpop.f32.mrf.mxu1 }
 0x3ab   : > { %v1394_v55 = vpop.f32.mrf.mxu1 }
 0x3ad   : > { %v2400_v11 = vpop.f32.mrf.mxu1 }
 0x3ae   : > { %v1494_v25 = vpack.c.bf16 %v2400_v11, %v2399_v15 }
 0x3af   : > { %v1397_v57 = vpop.f32.mrf.mxu1 }
 0x3b0   : > { %v1493_v37 = vpack.c.bf16 %v1397_v57, %v1394_v55 }
 0x3b1   : > { %v2403_v13 = vpop.f32.mrf.mxu1 }
 0x3b3   : > { %v1410_v58 = vpop.f32.mrf.mxu1 }
 0x3b5   : > { %v2404_v6 = vpop.f32.mrf.mxu1 }
 0x3b6   : > { %v1496_v28 = vpack.c.bf16 %v2404_v6, %v2403_v13 }
 0x3b7   : > { %v1413_v60 = vpop.f32.mrf.mxu1 }
 0x3b8   : > { %v1495_v21 = vpack.c.bf16 %v1413_v60, %v1410_v58 }
 0x3b9   : > { %v2407_v24 = vpop.f32.mrf.mxu1 }
 0x3bb   : > { %v1426_v59 = vpop.f32.mrf.mxu1 }
 0x3bd   : > { %v2408_v62 = vpop.f32.mrf.mxu1 }
 0x3be   : > { %v1498_v4 = vpack.c.bf16 %v2408_v62, %v2407_v24 }
 0x3bf   : > { %v1429_v53 = vpop.f32.mrf.mxu1 }
 0x3c0   : > { %v1497_v10 = vpack.c.bf16 %v1429_v53, %v1426_v59 }
 0x3c1   : > { %v2411_v40 = vpop.f32.mrf.mxu1 }
 0x3c3   : > { %v1442_v14 = vpop.f32.mrf.mxu1 }
 0x3c5   : > { %v2412_v5 = vpop.f32.mrf.mxu1 }
 0x3c6   : > { %v1500_v49 = vpack.c.bf16 %v2412_v5, %v2411_v40 }
 0x3c7   : > { %v1445_v8 = vpop.f32.mrf.mxu1 }
 0x3c8   : > { %v1499_v52 = vpack.c.bf16 %v1445_v8, %v1442_v14 }
 0x3c9   : > { %v2415_v33 = vpop.f32.mrf.mxu1 }
 0x3cb   : > { %v1458_v36 = vpop.f32.mrf.mxu1 }
 0x3cd   : > { %v2416_v3 = vpop.f32.mrf.mxu1 }
 0x3ce   : > { %v1502_v26 = vpack.c.bf16 %v2416_v3, %v2415_v33 }
 0x3cf   : > { %v1461_v32 = vpop.f32.mrf.mxu1 }
 0x3d0   : > { %v1501_v1 = vpack.c.bf16 %v1461_v32, %v1458_v36 }
 0x3d1   : > { %v2419_v17 = vpop.f32.mrf.mxu1 }
 0x3d3   : > { %v1474_v7 = vpop.f32.mrf.mxu1 }
 0x3d5   : > { %v2420_v61 = vpop.f32.mrf.mxu1 }
 0x3d6   : > { %v1504_v27 = vpack.c.bf16 %v2420_v61, %v2419_v17 }
 0x3d7   : > { %v1477_v56 = vpop.f32.mrf.mxu1 }
 0x3d8   : > { %v1503_v0 = vpack.c.bf16 %v1477_v56, %v1474_v7  ;;  %2191 = vmatprep.subr.bf16.mxu0 %v1504_v27 }
 0x3d9   : > { %2192 = vmatpush3.bf16.msra.mxu0 %v1496_v28 }
 0x3da   : > { %2193 = vmatprep.subr.bf16.mxu0 %v1503_v0 }
 0x3dd   : > { %2194 = vmatpush3.bf16.msra.mxu0 %v1495_v21 }
 0x3de   : > { %2195 = vmatprep.subr.bf16.mxu0 %v1502_v26 }
 0x3e1   : > { %2196 = vmatpush3.bf16.msra.mxu0 %v1494_v25 }
 0x3e2   : > { %2197 = vmatprep.subr.bf16.mxu0 %v1501_v1 }
 0x3e5   : > { %2198 = vmatpush3.bf16.msra.mxu0 %v1493_v37 }
 0x3e6   : > { %2199 = vmatprep.subr.bf16.mxu0 %v1500_v49 }
 0x3e9   : > { %2200 = vmatpush3.bf16.msra.mxu0 %v1492_v63 }
 0x3ea   : > { %2201 = vmatprep.subr.bf16.mxu0 %v1499_v52 }
 0x3ed   : > { %2202 = vmatpush3.bf16.msra.mxu0 %v1491_v54 }
 0x3ee   : > { %2203 = vmatprep.subr.bf16.mxu0 %v1498_v4 }
 0x3f1   : > { %2204 = vmatpush3.bf16.msra.mxu0 %v1490_v12 }
 0x3f2   : > { %2205 = vmatprep.subr.bf16.mxu0 %v1497_v10 }
 0x3f5   : > { %2206 = vmatpush3.bf16.msra.mxu0 %v1489_v2 }
 0x3f8   : > { %1544 = vmatmul.mubr.bf16.vlgmr.msra.gmra.mxu0 %v3069_v18  ;;  %v3514_v18 = vld [vmem:[#allocation25_spill] sm:$0xff] }
 0x3f9   : > { %1551 = vmatprep.mubr.bf16.mxu0 %v3072_v19  ;;  %v3515_v19 = vld [vmem:[#allocation26_spill] sm:$0xff] }
 0x400   : > { %1552 = vmatmul.mubr.bf16.gmra.mxu0 %v3079_v22  ;;  %v2597_v22 = vld [vmem:[%s3025_s25 + $0xb4] ss:$8 sps:$4 sm:$0xff]  }
 0x401   : > { %1559 = vmatprep.mubr.bf16.mxu0 %v3082_v23  ;;  %v2598_v23 = vld [vmem:[%s3025_s25 + $0xb0] ss:$8 sps:$4 sm:$0xff]  }
 0x408   : > { %1560 = vmatmul.mubr.bf16.gmra.mxu0 %v3091_v29  ;;  %v2599_v29 = vld [vmem:[%s3025_s25 + $0xc4] ss:$8 sps:$4 sm:$0xff]  }
 0x409   : > { %1567 = vmatprep.mubr.bf16.mxu0 %v3095_v31  ;;  %v2600_v31 = vld [vmem:[%s3025_s25 + $0xc0] ss:$8 sps:$4 sm:$0xff]   ;;  %s2003_s25 = sshll.u32 %s2863_s9, 7  ;;  %s2713_s9 = sshll.u32 %s2796_s4, 4  ;;  %s2714_s9 = int_to_ptr.vmem [resolvable:$false] %s2713_s9 }
 0x40a   : > { %s1776_s11 = scalar_lea.hbm %s3465_s8, %s2003_s25  ;;  %s2715_s23 = scalar_lea.vmem %s2714_s9, 256 }
 0x40b   : > { %p2716_p13 = scmp.lt.s32.totalorder %s1779_s29, %s2714_s9  ;;  %p2717_p1 = scmp.lt.s32.totalorder %s2715_s23, %s2709_s15 }
 0x40d   : > { %p2718_p4 = por %p2717_p1, %p2716_p13 }
 0x40f   : > { %p2719_p5 = pnand %p2718_p4, %p2712_p9 }
 0x410   : > { %1568 = vmatmul.mubr.bf16.gmra.mxu0 %v3108_v34  ;;  %v3516_v34 = vld [vmem:[#allocation19_spill] sm:$0xff] }
 0x411   : > { %1575 = vmatprep.mubr.bf16.mxu0 %v3111_v35  ;;  %v3517_v35 = vld [vmem:[#allocation20_spill] sm:$0xff] }
 0x418   : > { %1576 = vmatmul.mubr.bf16.gmra.mxu0 %v3124_v38  ;;  %v3518_v38 = vld [vmem:[#allocation21_spill] sm:$0xff] }
 0x419   : > { %1583 = vmatprep.mubr.bf16.mxu0 %v3127_v39  ;;  %v3519_v39 = vld [vmem:[#allocation22_spill] sm:$0xff] }
 0x420   : > { %1584 = vmatmul.mubr.bf16.gmra.mxu0 %v3136_v41  ;;  %v3520_v41 = vld [vmem:[#allocation23_spill] sm:$0xff] }
 0x421   : > { %1591 = vmatprep.mubr.bf16.mxu0 %v3139_v42  ;;  %v3521_v42 = vld [vmem:[#allocation24_spill] sm:$0xff] }
 0x428   : > { %1592 = vmatmul.mubr.bf16.gmra.mxu0 %v3144_v43 }
 0x429   : > { %1599 = vmatprep.mubr.bf16.mxu0 %v3147_v44 }
 0x430   : > { %1600 = vmatmul.mubr.bf16.gmra.mxu0 %v3152_v45 }
 0x431   : > { %1607 = vmatprep.mubr.bf16.mxu0 %v3155_v46  ;;  %v3355_v46 = vld [vmem:[%s3464_s7] ss:$0 sm:$0xff] }
 0x438   : > { %1608 = vmatmul.mubr.bf16.gmra.mxu0 %v3160_v47 }
 0x439   : > { %1615 = vmatprep.mubr.bf16.mxu0 %v3163_v48 }
 0x440   : > { %1616 = vmatmul.mubr.bf16.gmra.mxu0 %v3168_v50 }
 0x441   : > { %1623 = vmatprep.mubr.bf16.mxu0 %v3514_v18 }
 0x448   : > { %1624 = vmatmul.mubr.bf16.gmra.mxu0 %v3515_v19 }
 0x449   : > { %1631 = vmatprep.mubr.bf16.mxu0 %v2597_v22 }
 0x450   : > { %1632 = vmatmul.mubr.bf16.gmra.mxu0 %v2598_v23 }
 0x451   : > { %1639 = vmatprep.mubr.bf16.mxu0 %v2599_v29 }
 0x458   : > { %1640 = vmatmul.mubr.bf16.gmra.mxu0 %v2600_v31 }
 0x459   : > { %1647 = vmatprep.mubr.bf16.mxu0 %v3516_v34 }
 0x460   : > { %1648 = vmatmul.mubr.bf16.gmra.mxu0 %v3517_v35 }
 0x461   : > { %1655 = vmatprep.mubr.bf16.mxu0 %v3518_v38 }
 0x468   : > { %1656 = vmatmul.mubr.bf16.gmra.mxu0 %v3519_v39 }
 0x469   : > { %1663 = vmatprep.mubr.bf16.mxu0 %v3520_v41 }
 0x470   : > { %1664 = vmatmul.mubr.bf16.gmra.mxu0 %v3521_v42 }
 0x4b8   : > { %v2207_v43 = vpop.f32.mrf.mxu0 }
 0x4ba   : > { %v2208_v44 = vpop.f32.mrf.mxu0 }
 0x4bb   : > { %v2209_v45 = vadd.f32 %v2208_v44, %v2207_v43 }
 0x4bc   : > { %v2210_v47 = vpop.f32.mrf.mxu0 }
 0x4bd   : > { %v1546_v50 = vadd.f32 %v2209_v45, %v3355_v46 }
 0x4be   : > { %v2211_v48 = vpop.f32.mrf.mxu0 }
 0x4bf   : > { %v2212_v12 = vadd.f32 %v2211_v48, %v2210_v47  ;;  %v1672_v63 = vmax.f32 %v1546_v50, 0.0 }
 0x4c0   : > { %v2213_v2 = vpop.f32.mrf.mxu0 }
 0x4c1   : > { %v1549_v30 = vadd.f32 %v2212_v12, %v3355_v46 }
 0x4c2   : > { %v2214_v20 = vpop.f32.mrf.mxu0 }
 0x4c3   : > { %v1673_v51 = vmax.f32 %v1549_v30, 0.0  ;;  %v2215_v54 = vadd.f32 %v2214_v20, %v2213_v2 }
 0x4c4   : > { %v2216_v15 = vpop.f32.mrf.mxu0 }
 0x4c5   : > { %v3359_v55 = vpack.c.bf16 %v1673_v51, %v1672_v63  ;;  %v1554_v57 = vadd.f32 %v2215_v54, %v3355_v46 }
 0x4c6   : > { %v2217_v11 = vpop.f32.mrf.mxu0 }
 0x4c7   : > { %v2218_v13 = vadd.f32 %v2217_v11, %v2216_v15  ;;  %v1674_v24 = vmax.f32 %v1554_v57, 0.0 }
 0x4c8   : > { %v2219_v58 = vpop.f32.mrf.mxu0 }
 0x4c9   : > { %v1557_v6 = vadd.f32 %v2218_v13, %v3355_v46 }
 0x4ca   : > { %v2220_v60 = vpop.f32.mrf.mxu0 }
 0x4cb   : > { %v1675_v59 = vmax.f32 %v1557_v6, 0.0  ;;  %v2221_v62 = vadd.f32 %v2220_v60, %v2219_v58 }
 0x4cc   : > { %v2222_v53 = vpop.f32.mrf.mxu0 }
 0x4cd   : > { %v3363_v40 = vpack.c.bf16 %v1675_v59, %v1674_v24  ;;  %v1562_v5 = vadd.f32 %v2221_v62, %v3355_v46 }
 0x4ce   : > { %v2223_v14 = vpop.f32.mrf.mxu0 }
 0x4cf   : > { %v2224_v8 = vadd.f32 %v2223_v14, %v2222_v53  ;;  %v1676_v32 = vmax.f32 %v1562_v5, 0.0 }
 0x4d0   : > { %v2225_v33 = vpop.f32.mrf.mxu0 }
 0x4d1   : > { %v1565_v36 = vadd.f32 %v2224_v8, %v3355_v46 }
 0x4d2   : > { %v2226_v3 = vpop.f32.mrf.mxu0 }
 0x4d3   : > { %v1677_v17 = vmax.f32 %v1565_v36, 0.0  ;;  %v2227_v7 = vadd.f32 %v2226_v3, %v2225_v33 }
 0x4d4   : > { %v2228_v61 = vpop.f32.mrf.mxu0 }
 0x4d5   : > { %v3367_v27 = vpack.c.bf16 %v1677_v17, %v1676_v32  ;;  %v1570_v56 = vadd.f32 %v2227_v7, %v3355_v46 }
 0x4d6   : > { %v2229_v28 = vpop.f32.mrf.mxu0 }
 0x4d7   : > { %v2230_v0 = vadd.f32 %v2229_v28, %v2228_v61  ;;  %v1678_v1 = vmax.f32 %v1570_v56, 0.0 }
 0x4d8   : > { %v2231_v21 = vpop.f32.mrf.mxu0 }
 0x4d9   : > { %v1573_v26 = vadd.f32 %v2230_v0, %v3355_v46 }
 0x4da   : > { %v2232_v25 = vpop.f32.mrf.mxu0 }
 0x4db   : > { %v1679_v37 = vmax.f32 %v1573_v26, 0.0  ;;  %v2233_v49 = vadd.f32 %v2232_v25, %v2231_v21 }
 0x4dc   : > { %v2234_v52 = vpop.f32.mrf.mxu0 }
 0x4dd   : > { %v3371_v4 = vpack.c.bf16 %v1679_v37, %v1678_v1  ;;  %v1578_v18 = vadd.f32 %v2233_v49, %v3355_v46 }
 0x4de   : > { %v2235_v10 = vpop.f32.mrf.mxu0 }
 0x4df   : > { %v2236_v19 = vadd.f32 %v2235_v10, %v2234_v52  ;;  %v1680_v31 = vmax.f32 %v1578_v18, 0.0 }
 0x4e0   : > { %v2237_v22 = vpop.f32.mrf.mxu0 }
 0x4e1   : > { %v1581_v23 = vadd.f32 %v2236_v19, %v3355_v46 }
 0x4e2   : > { %v2238_v29 = vpop.f32.mrf.mxu0 }
 0x4e3   : > { %v1681_v34 = vmax.f32 %v1581_v23, 0.0  ;;  %v2239_v35 = vadd.f32 %v2238_v29, %v2237_v22 }
 0x4e4   : > { %v2240_v38 = vpop.f32.mrf.mxu0 }
 0x4e5   : > { %v3375_v39 = vpack.c.bf16 %v1681_v34, %v1680_v31  ;;  %v1586_v42 = vadd.f32 %v2239_v35, %v3355_v46 }
 0x4e6   : > { %v2241_v41 = vpop.f32.mrf.mxu0 }
 0x4e7   : > { %v2242_v43 = vadd.f32 %v2241_v41, %v2240_v38  ;;  %v1682_v48 = vmax.f32 %v1586_v42, 0.0 }
 0x4e8   : > { %v2243_v44 = vpop.f32.mrf.mxu0 }
 0x4e9   : > { %v1589_v45 = vadd.f32 %v2242_v43, %v3355_v46 }
 0x4ea   : > { %v2244_v47 = vpop.f32.mrf.mxu0 }
 0x4eb   : > { %v1683_v50 = vmax.f32 %v1589_v45, 0.0  ;;  %v2245_v12 = vadd.f32 %v2244_v47, %v2243_v44 }
 0x4ec   : > { %v2246_v2 = vpop.f32.mrf.mxu0 }
 0x4ed   : > { %v3379_v30 = vpack.c.bf16 %v1683_v50, %v1682_v48  ;;  %v1594_v63 = vadd.f32 %v2245_v12, %v3355_v46 }
 0x4ee   : > { %v2247_v20 = vpop.f32.mrf.mxu0 }
 0x4ef   : > { %v2248_v51 = vadd.f32 %v2247_v20, %v2246_v2  ;;  %v1684_v57 = vmax.f32 %v1594_v63, 0.0 }
 0x4f0   : > { %v2249_v54 = vpop.f32.mrf.mxu0 }
 0x4f1   : > { %v1597_v15 = vadd.f32 %v2248_v51, %v3355_v46 }
 0x4f2   : > { %v2250_v11 = vpop.f32.mrf.mxu0 }
 0x4f3   : > { %v1685_v13 = vmax.f32 %v1597_v15, 0.0  ;;  %v2251_v58 = vadd.f32 %v2250_v11, %v2249_v54 }
 0x4f4   : > { %v2252_v6 = vpop.f32.mrf.mxu0 }
 0x4f5   : > { %v3383_v60 = vpack.c.bf16 %v1685_v13, %v1684_v57  ;;  %v1602_v59 = vadd.f32 %v2251_v58, %v3355_v46 }
 0x4f6   : > { %v2253_v24 = vpop.f32.mrf.mxu0 }
 0x4f7   : > { %v2254_v62 = vadd.f32 %v2253_v24, %v2252_v6  ;;  %v1686_v8 = vmax.f32 %v1602_v59, 0.0 }
 0x4f8   : > { %v2255_v53 = vpop.f32.mrf.mxu0 }
 0x4f9   : > { %v1605_v14 = vadd.f32 %v2254_v62, %v3355_v46 }
 0x4fa   : > { %v2256_v5 = vpop.f32.mrf.mxu0 }
 0x4fb   : > { %v1687_v33 = vmax.f32 %v1605_v14, 0.0  ;;  %v2257_v36 = vadd.f32 %v2256_v5, %v2255_v53 }
 0x4fc   : > { %v2258_v3 = vpop.f32.mrf.mxu0 }
 0x4fd   : > { %v3387_v32 = vpack.c.bf16 %v1687_v33, %v1686_v8  ;;  %v1610_v7 = vadd.f32 %v2257_v36, %v3355_v46 }
 0x4fe   : > { %v2259_v17 = vpop.f32.mrf.mxu0 }
 0x4ff   : > { %v2260_v61 = vadd.f32 %v2259_v17, %v2258_v3  ;;  %v1688_v21 = vmax.f32 %v1610_v7, 0.0 }
 0x500   : > { %v2261_v28 = vpop.f32.mrf.mxu0 }
 0x501   : > { %v1613_v56 = vadd.f32 %v2260_v61, %v3355_v46 }
 0x502   : > { %v2262_v0 = vpop.f32.mrf.mxu0 }
 0x503   : > { %v1689_v26 = vmax.f32 %v1613_v56, 0.0  ;;  %v2263_v25 = vadd.f32 %v2262_v0, %v2261_v28 }
 0x504   : > { %v2264_v1 = vpop.f32.mrf.mxu0 }
 0x505   : > { %v3391_v37 = vpack.c.bf16 %v1689_v26, %v1688_v21  ;;  %v1618_v52 = vadd.f32 %v2263_v25, %v3355_v46 }
 0x506   : > { %v2265_v49 = vpop.f32.mrf.mxu0 }
 0x507   : > { %v2266_v10 = vadd.f32 %v2265_v49, %v2264_v1  ;;  %v1690_v23 = vmax.f32 %v1618_v52, 0.0 }
 0x508   : > { %v2267_v18 = vpop.f32.mrf.mxu0 }
 0x509   : > { %v1621_v19 = vadd.f32 %v2266_v10, %v3355_v46 }
 0x50a   : > { %v2268_v22 = vpop.f32.mrf.mxu0 }
 0x50b   : > { %v1691_v29 = vmax.f32 %v1621_v19, 0.0 }
 0x50c   : > { %v2270_v31 = vpop.f32.mrf.mxu0 }
 0x50d   : > { %v3395_v34 = vpack.c.bf16 %v1691_v29, %v1690_v23 }
 0x50e   : > { %v2271_v35 = vpop.f32.mrf.mxu0 }
 0x50f   : > { %v2272_v29 = vadd.f32 %v2271_v35, %v2270_v31 }
 0x510   : > { %v2273_v38 = vpop.f32.mrf.mxu0 }
 0x512   : > { %v2274_v41 = vpop.f32.mrf.mxu0 }
 0x513   : > { %v2275_v10 = vadd.f32 %v2274_v41, %v2273_v38 }
 0x514   : > { %v2276_v42 = vpop.f32.mrf.mxu0 }
 0x516   : > { %v2277_v43 = vpop.f32.mrf.mxu0 }
 0x517   : > { %v2278_v25 = vadd.f32 %v2277_v43, %v2276_v42  ;;  %v2269_v42 = vadd.f32 %v2268_v22, %v2267_v18  ;;  %v1634_v43 = vadd.f32 %v2275_v10, %v3355_v46 }
 0x518   : > { %v2279_v44 = vpop.f32.mrf.mxu0 }
 0x519   : > { %v1626_v41 = vadd.f32 %v2269_v42, %v3355_v46  ;;  %v1694_v31 = vmax.f32 %v1634_v43, 0.0 }
 0x51a   : > { %v2280_v45 = vpop.f32.mrf.mxu0 }
 0x51b   : > { %v2281_v56 = vadd.f32 %v2280_v45, %v2279_v44  ;;  %v1637_v44 = vadd.f32 %v2278_v25, %v3355_v46 }
 0x51c   : > { %v2282_v47 = vpop.f32.mrf.mxu0 }
 0x51d   : > { %v1642_v19 = vadd.f32 %v2281_v56, %v3355_v46 }
 0x51e   : > { %v2283_v48 = vpop.f32.mrf.mxu0 }
 0x51f   : > { %v2284_v3 = vadd.f32 %v2283_v48, %v2282_v47  ;;  %v1696_v48 = vmax.f32 %v1642_v19, 0.0 }
 0x520   : > { %v2285_v50 = vpop.f32.mrf.mxu0 }
 0x521   : > { %v1645_v1 = vadd.f32 %v2284_v3, %v3355_v46 }
 0x522   : > { %v2286_v12 = vpop.f32.mrf.mxu0 }
 0x523   : > { %v2287_v8 = vadd.f32 %v2286_v12, %v2285_v50  ;;  %v1697_v45 = vmax.f32 %v1645_v1, 0.0  ;;  %v1629_v50 = vadd.f32 %v2272_v29, %v3355_v46 }
 0x524   : > { %v2288_v2 = vpop.f32.mrf.mxu0 }
 0x525   : > { %v1650_v0 = vadd.f32 %v2287_v8, %v3355_v46  ;;  %v1716_v38 = vpack.c.bf16 %v1697_v45, %v1696_v48  ;;  %v1693_v35 = vmax.f32 %v1629_v50, 0.0 }
 0x526   : > { %v2289_v20 = vpop.f32.mrf.mxu0 }
 0x527   : > { %v2290_v62 = vadd.f32 %v2289_v20, %v2288_v2  ;;  %v1698_v23 = vmax.f32 %v1650_v0, 0.0 }
 0x528   : > { %v2291_v63 = vpop.f32.mrf.mxu0 }
 0x529   : > { %v1653_v17 = vadd.f32 %v2290_v62, %v3355_v46 }
 0x52a   : > { %v2292_v51 = vpop.f32.mrf.mxu0 }
 0x52b   : > { %v2293_v24 = vadd.f32 %v2292_v51, %v2291_v63  ;;  %v1699_v49 = vmax.f32 %v1653_v17, 0.0 }
 0x52c   : > { %v2294_v54 = vpop.f32.mrf.mxu0 }
 0x52d   : > { %v1658_v33 = vadd.f32 %v2293_v24, %v3355_v46  ;;  %v1717_v47 = vpack.c.bf16 %v1699_v49, %v1698_v23 }
 0x52e   : > { %v2295_v15 = vpop.f32.mrf.mxu0 }
 0x52f   : > { %v2296_v13 = vadd.f32 %v2295_v15, %v2294_v54  ;;  %v1700_v21 = vmax.f32 %v1658_v33, 0.0 }
 0x530   : > { %v2297_v11 = vpop.f32.mrf.mxu0 }
 0x531   : > { %v1661_v53 = vadd.f32 %v2296_v13, %v3355_v46 }
 0x532   : > { %v2298_v57 = vpop.f32.mrf.mxu0 }
 0x533   : > { %v2299_v58 = vadd.f32 %v2298_v57, %v2297_v11  ;;  %v1701_v7 = vmax.f32 %v1661_v53, 0.0 }
 0x534   : > { %v2300_v6 = vpop.f32.mrf.mxu0 }
 0x535   : > { %v1666_v14 = vadd.f32 %v2299_v58, %v3355_v46  ;;  %v1718_v52 = vpack.c.bf16 %v1701_v7, %v1700_v21 }
 0x536   : > { %v2301_v59 = vpop.f32.mrf.mxu0 }
 0x537   : > { %v2302_v5 = vadd.f32 %v2301_v59, %v2300_v6  ;;  %v1702_v61 = vmax.f32 %v1666_v14, 0.0 }
 0x539   : > { %v1669_v36 = vadd.f32 %v2302_v5, %v3355_v46 }
 0x53b   : > { %v1703_v28 = vmax.f32 %v1669_v36, 0.0 }
 0x53d   : > { %v1719_v26 = vpack.c.bf16 %v1703_v28, %v1702_v61 }
 0x53f   : > { %2303 = vmatprep.subr.bf16.mxu1 %v1719_v26 }
 0x540   : > { %2304 = vmatpush3.bf16.msra.mxu1 %v3387_v32  ;;  %v1695_v32 = vmax.f32 %v1637_v44, 0.0 }
 0x541   : > { %2305 = vmatprep.subr.bf16.mxu1 %v1718_v52 }
 0x542   : > { %v1715_v12 = vpack.c.bf16 %v1695_v32, %v1694_v31 }
 0x544   : > { %2306 = vmatpush3.bf16.msra.mxu1 %v3383_v60  ;;  %v1692_v60 = vmax.f32 %v1626_v41, 0.0 }
 0x545   : > { %2307 = vmatprep.subr.bf16.mxu1 %v1717_v47 }
 0x546   : > { %v1714_v18 = vpack.c.bf16 %v1693_v35, %v1692_v60 }
 0x548   : > { %2308 = vmatpush3.bf16.msra.mxu1 %v3379_v30 }
 0x549   : > { %2309 = vmatprep.subr.bf16.mxu1 %v1716_v38 }
 0x54c   : > { %2310 = vmatpush3.bf16.msra.mxu1 %v3375_v39 }
 0x54d   : > { %2311 = vmatprep.subr.bf16.mxu1 %v1715_v12 }
 0x550   : > { %2312 = vmatpush3.bf16.msra.mxu1 %v3371_v4  ;;  %v1277_v4 = vpop.permute.xlu0 %1276 }
 0x551   : > { %2313 = vmatprep.subr.bf16.mxu1 %v1714_v18 }
 0x554   : > { %2314 = vmatpush3.bf16.msra.mxu1 %v3367_v27 }
 0x555   : > { %2315 = vmatprep.subr.bf16.mxu1 %v3395_v34 }
 0x558   : > { %2316 = vmatpush3.bf16.msra.mxu1 %v3363_v40  ;;  %v1279_v40 = vmul.f32 %v3319_v16, %v1277_v4 }
 0x559   : > { %2317 = vmatprep.subr.bf16.mxu1 %v3391_v37 }
 0x55c   : > { %2318 = vmatpush3.bf16.msra.mxu1 %v3359_v55 }
 0x55f   : > { %1753 = vmatmul.mubr.bf16.vlgmr.msra.gmra.mxu1 %v3303_v9 }
 0x61f   : > { %v2319_v46 = vpop.f32.mrf.mxu1 }
 0x621   : > { %v2320_v39 = vpop.f32.mrf.mxu1 }
 0x622   : > { %v2321_v30 = vadd.f32 %v2320_v39, %v2319_v46 }
 0x623   : > { %v2322_v22 = vpop.f32.mrf.mxu1 }
 0x624   : > { %v1760_v2 = vmul.f32 %v2321_v30, %v1277_v4 }
 0x625   : > { %v2323_v27 = vpop.f32.mrf.mxu1 }
 0x626   : > { %v1761_v37 = vmul.f32 2.0, %v1760_v2 }
 0x628   : > { %v1762_v34 = vadd.f32 %v1761_v37, %v1279_v40 }
 0x62a   : > { %1763 = vst [vmem:[%s420_s6] sm:$0xff] %v1762_v34 }
 0x62b   : > { %2722 = shalt.err (!%p2719_p5)
}
 0x62c   : > { %s2723_s0 = scalar_lea.hbm %s1776_s11, 128  ;;  %s2727_s24 = scalar_lea.hbm %s3465_s8, 256 }
 0x62d   : > { %p2724_p7 = scmp.ne.s32.totalorder %s1776_s11, %s2723_s0  ;;  %p2728_p6 = scmp.lt.s32.totalorder %s1776_s11, %s3465_s8 }
 0x62e   : > { %p2729_p12 = scmp.lt.s32.totalorder %s2727_s24, %s2723_s0 }
 0x62f   : > { %p2725_p8 = pnand %p2724_p7, %p3522_p3 }
 0x630   : > { %p2730_p0 = por %p2729_p12, %p2728_p6 }
 0x631   : > { %p2726_p2 = pneg %p2725_p8 }
 0x633   : > { %p2731_p10 = pnand %p2730_p0, %p2726_p2 }
 0x635   : > { %2734 = shalt.err (!%p2731_p10)
}
 0x636   : > { %2449 = dma.vmem_to_hbm [thread:$0]  (%p3522_p3), %s1779_s29, 128, %s1776_s11, %s1765_s21  }
 0x637 PF: > { %s1790_s18 = sand.u32 1, %s2773_s27   ;;  %p3523_p11 = scmp.ne.s32.totalorder %s3487_s12, 0 }
 0x638   : > { %p3524_p9 = scmp.ge.s32.totalorder %s2785_s30, 2  ;;  %s1791_s20 = scalar_lea.sflag [#allocation4], %s1790_s18 }
 0x63a   : > { %p2466_p13 = pnand %p3524_p9, %p3523_p11 }
 0x63c   : > { %p2467_p1 = pneg %p2466_p13 }
 0x63e   : > { %2768 = dma.done.wait (%p2467_p1), %s1791_s20, 128  }
 0x63f   : > { %2770 = vsyncadd (%p2467_p1), %s1791_s20, 4294967168  ;;  %s3525_s30 = sld [smem:[#allocation17_spill]]  ;;  %s3528_s27 = smov %s2777_s28 }
 0x640   : > { %s3526_s19 = sld [smem:[#allocation16_spill]] }
 0x641   : > { %s3527_s29 = sld [smem:[#allocation18_spill]] }
 0x645   : > { %p25_p4 = scmp.ge.s32.totalorder %s3525_s30, 4  }
 0x646   : > { %s3529_s28 = smov %s3526_s19 }
 0x647   :  { %27 = sbr.rel (!%p25_p4) target bundleno = 12 (0xc), region = 124 }
 0x64c   :  { %1796 = vsyncpa [#allocation3], 1 }
 0x64d   :  { %1798 = vsyncpa [#allocation3 + $0x1], 1 }
 0x64e   :  { %1799 = vsyncpa [#allocation6], 1 }
 0x64f   :  { %1801 = vsyncpa [#allocation6 + $0x1], 1 }
 0x650   :  { %1802 = vsyncpa [#allocation9], 1 }
 0x651   :  { %1803 = vsyncpa [#allocation4], 1 }
 0x652   :  { %1805 = vsyncpa [#allocation4 + $0x1], 1 }

</bundles_post_ra>
